<compile_context>
chip_gen: v7x
topology: tpu7x:2x2x1
jax: 0.10.0
libtpu: 0.0.40
codegen_flags: <defaults>
</compile_context>

<pallas_src>
import functools

import jax
import jax.numpy as jnp
from jax.experimental import pallas as pl
from jax.experimental.pallas import tpu as pltpu


_NEG_INF = -9e15  # pyGAT's masking constant


def _elu(x):
    # F.elu; the min() keeps the untaken exp branch finite for large positives.
    return jnp.where(x > 0, x, jnp.exp(jnp.minimum(x, 0.0)) - 1.0)


def _pick_tile_n(n, max_tile=512):
    """Largest 128-multiple divisor of n that is <= max_tile, else n (full rows)."""
    t = min(max_tile, n)
    t -= t % 128
    while t >= 128:
        if n % t == 0:
            return t
        t -= 128
    return n


# ----------------------------------------------------------------------------
# Kernel A: batched per-head projection + attention-score columns
# ----------------------------------------------------------------------------
def _proj_kernel(x_ref, wext_ref, wh_ref, es_ref, edt_ref, whe_scratch,
                 *, nheads, nhid):
    # x_ref     : [T, F]                       (row tile)
    # wext_ref  : [F, nheads*nhid + 2*nheads]  (grid-invariant)
    # wh_ref    : [nheads, T, nhid]  bf16
    # es_ref    : [nheads, T, 1]     f32   (wh_i . a_src per node)
    # edt_ref   : [nheads, 1, T]     f32   (wh_j . a_dst per node, as a lane row)
    # whe_scratch: [T, K] f32 VMEM
    whe_scratch[...] = jnp.dot(x_ref[...], wext_ref[...],
                               preferred_element_type=jnp.float32)
    base = nheads * nhid
    for h in range(nheads):  # static unroll
        wh_ref[h] = whe_scratch[:, h * nhid:(h + 1) * nhid].astype(jnp.bfloat16)
        es_ref[h] = whe_scratch[:, base + h:base + h + 1]
        # one small [T,1]->[1,T] transpose per (tile, head), instead of an
        # [N,1]->[1,N] transpose on every attention step.
        edt_ref[h] = jnp.transpose(
            whe_scratch[:, base + nheads + h:base + nheads + h + 1])


def gat_project(x, w_ext, *, nheads, nhid, tile_n):
    N, F = x.shape
    K = w_ext.shape[1]
    n_tiles = N // tile_n
    flops = 2 * N * F * K
    bytes_accessed = 4 * N * F + 4 * F * K + 2 * N * nheads * nhid + 8 * N * nheads
    return pl.pallas_call(
        functools.partial(_proj_kernel, nheads=nheads, nhid=nhid),
        out_shape=(
            jax.ShapeDtypeStruct((nheads, N, nhid), jnp.bfloat16),
            jax.ShapeDtypeStruct((nheads, N, 1), jnp.float32),
            jax.ShapeDtypeStruct((nheads, 1, N), jnp.float32),
        ),
        grid_spec=pltpu.PrefetchScalarGridSpec(
            num_scalar_prefetch=0,
            grid=(n_tiles,),
            in_specs=[
                pl.BlockSpec((tile_n, F), lambda r: (r, 0)),
                pl.BlockSpec((F, K), lambda r: (0, 0)),
            ],
            out_specs=(
                pl.BlockSpec((nheads, tile_n, nhid), lambda r: (0, r, 0)),
                pl.BlockSpec((nheads, tile_n, 1), lambda r: (0, r, 0)),
                pl.BlockSpec((nheads, 1, tile_n), lambda r: (0, 0, r)),
            ),
            scratch_shapes=[pltpu.VMEM((tile_n, K), jnp.float32)],
        ),
        compiler_params=pltpu.CompilerParams(dimension_semantics=("parallel",)),
        cost_estimate=pl.CostEstimate(flops=int(flops), transcendentals=0,
                                      bytes_accessed=int(bytes_accessed)),
    )(x, w_ext)


# ----------------------------------------------------------------------------
# Kernel B: one (row tile, head) block of dense GAT attention
# ----------------------------------------------------------------------------
def _attn_head_kernel(adj_ref, wh_ref, es_ref, edt_ref, att_ref, *, alpha):
    # adj_ref : [T, N]      bf16   (row tile of adjacency, all source columns)
    # wh_ref  : [1, N, H]   bf16   (this head's projected features, all nodes)
    # es_ref  : [1, T, 1]   f32
    # edt_ref : [1, 1, N]   f32
    # att_ref : [1, T, H]   f32
    e = es_ref[0] + edt_ref[0]                         # [T,1]+[1,N] -> [T,N]
    e = jnp.where(e > 0, e, alpha * e)                 # LeakyReLU(alpha)
    e = jnp.where(adj_ref[...] > 0, e, jnp.float32(_NEG_INF))
    # Row-wise softmax (rows with no edges degrade to uniform, same as pyGAT;
    # the demo adjacency always contains self-loops).
    m = jnp.max(e, axis=1, keepdims=True)
    p = jnp.exp(e - m)
    attn = p * pl.reciprocal(jnp.sum(p, axis=1, keepdims=True), approx=True)
    h_out = jnp.dot(attn.astype(jnp.bfloat16), wh_ref[0],
                    preferred_element_type=jnp.float32)            # [T, H]
    att_ref[0] = _elu(h_out)                           # concat=True -> ELU


def gat_attention(adj_b, wh, esrc, edstt, *, alpha, tile_n):
    nheads, N, H = wh.shape
    n_tiles = N // tile_n
    flops = nheads * (2 * N * N * H + 8 * N * N)
    transcendentals = nheads * N * N
    bytes_accessed = 2 * N * N + nheads * (2 * N * H + 8 * N) + 4 * nheads * N * H
    return pl.pallas_call(
        functools.partial(_attn_head_kernel, alpha=alpha),
        out_shape=jax.ShapeDtypeStruct((nheads, N, H), jnp.float32),
        grid_spec=pltpu.PrefetchScalarGridSpec(
            num_scalar_prefetch=0,
            # rows outermost, heads innermost -> adj row tile is DMA'd once and
            # reused for every head (adj is the dominant HBM operand).
            grid=(n_tiles, nheads),
            in_specs=[
                pl.BlockSpec((tile_n, N), lambda r, h: (r, 0)),       # adj tile
                pl.BlockSpec((1, N, H), lambda r, h: (h, 0, 0)),      # WH head
                pl.BlockSpec((1, tile_n, 1), lambda r, h: (h, r, 0)), # e_src
                pl.BlockSpec((1, 1, N), lambda r, h: (h, 0, 0)),      # e_dst row
            ],
            out_specs=pl.BlockSpec((1, tile_n, H), lambda r, h: (h, r, 0)),
        ),
        compiler_params=pltpu.CompilerParams(
            dimension_semantics=("parallel", "parallel")),
        cost_estimate=pl.CostEstimate(flops=int(flops),
                                      transcendentals=int(transcendentals),
                                      bytes_accessed=int(bytes_accessed)),
    )(adj_b, wh, esrc, edstt)


# ----------------------------------------------------------------------------
# Kernel C: output CovLayer (graph conv) + ELU + log_softmax(dim=1), row-tiled
# ----------------------------------------------------------------------------
def _out_kernel(att_ref, adj_ref, wout_ref, b_ref, out_ref, *, nheads):
    # att_ref : [nheads, N, H] f32   (grid-invariant, resident)
    # adj_ref : [T, N]         bf16
    # wout_ref: [nheads, H, C] f32
    # b_ref   : [1, C]         f32
    # out_ref : [T, C]         f32
    # hw == concat(att, axis=1) @ W_out, computed head-by-head so the concat is
    # never materialized; recomputed per row tile (tiny) to keep the grid parallel.
    hw = jnp.dot(att_ref[0], wout_ref[0], preferred_element_type=jnp.float32)
    for h in range(1, nheads):  # static unroll
        hw = hw + jnp.dot(att_ref[h], wout_ref[h],
                          preferred_element_type=jnp.float32)
    z = jnp.dot(adj_ref[...], hw.astype(jnp.bfloat16),
                preferred_element_type=jnp.float32) + b_ref[...]
    y = _elu(z)
    m = jnp.max(y, axis=1, keepdims=True)
    lse = jnp.log(jnp.sum(jnp.exp(y - m), axis=1, keepdims=True))
    out_ref[...] = y - m - lse


def gat_out_layer(att, adj_b, w_out3, b_out, *, tile_n):
    nheads, N, H = att.shape
    C = w_out3.shape[-1]
    n_tiles = N // tile_n
    flops = 2 * N * N * C + 2 * nheads * N * H * C * n_tiles + 8 * N * C
    transcendentals = 2 * N * C
    bytes_accessed = 2 * N * N + 4 * nheads * N * H + 4 * N * C
    return pl.pallas_call(
        functools.partial(_out_kernel, nheads=nheads),
        out_shape=jax.ShapeDtypeStruct((N, C), jnp.float32),
        grid_spec=pltpu.PrefetchScalarGridSpec(
            num_scalar_prefetch=0,
            grid=(n_tiles,),
            in_specs=[
                pl.BlockSpec((nheads, N, H), lambda r: (0, 0, 0)),
                pl.BlockSpec((tile_n, N), lambda r: (r, 0)),
                pl.BlockSpec((nheads, H, C), lambda r: (0, 0, 0)),
                pl.BlockSpec((1, C), lambda r: (0, 0)),
            ],
            out_specs=pl.BlockSpec((tile_n, C), lambda r: (r, 0)),
        ),
        compiler_params=pltpu.CompilerParams(dimension_semantics=("parallel",)),
        cost_estimate=pl.CostEstimate(flops=int(flops),
                                      transcendentals=int(transcendentals),
                                      bytes_accessed=int(bytes_accessed)),
    )(att, adj_b, w_out3, b_out)


# ----------------------------------------------------------------------------
# Full GAT forward (inference mode: dropout = identity)
# ----------------------------------------------------------------------------
def gat_forward(x, adj, params, *, alpha, tile_n=None):
    N, F = x.shape
    W = params["W"]            # [nheads, F, nhid]
    a = params["a"]            # [nheads, 2, nhid]
    nheads, _, nhid = W.shape
    if tile_n is None:
        tile_n = _pick_tile_n(N)
    assert N % tile_n == 0 and (tile_n == N or tile_n % 128 == 0), \
        "tile_n must divide N and be a multiple of 128 (or equal to N)"
    # NOTE: for very large N, additionally set
    # pltpu.CompilerParams(vmem_limit_bytes=...) and/or shrink tile_n.

    # 0/1 adjacency is exact in bf16; halves HBM/VMEM traffic of the dominant operand.
    adj_b = adj.astype(jnp.bfloat16)

    # Fold a_src / a_dst into the projection matmul (parameter-sized prep, done once):
    # W_ext = [W_0 .. W_{nh-1} | W_h a_src_h | W_h a_dst_h]
    w_cat = jnp.transpose(W, (1, 0, 2)).reshape(F, nheads * nhid)
    w_src = jnp.einsum("hfd,hd->fh", W, a[:, 0, :])
    w_dst = jnp.einsum("hfd,hd->fh", W, a[:, 1, :])
    w_ext = jnp.concatenate([w_cat, w_src, w_dst], axis=1)  # [F, nheads*nhid + 2*nheads]

    # x = F.dropout(x, p, training=False) -> identity
    wh, esrc, edstt = gat_project(x, w_ext, nheads=nheads, nhid=nhid, tile_n=tile_n)
    att = gat_attention(adj_b, wh, esrc, edstt, alpha=alpha, tile_n=tile_n)
    # x = F.dropout(x, p, training=False) -> identity
    w_out3 = params["W_out"].reshape(nheads, nhid, -1)  # head-major rows match concat
    return gat_out_layer(att, adj_b, w_out3, params["b_out"], tile_n=tile_n)


# ----------------------------------------------------------------------------
# Pure-JAX reference (mirrors the bf16 matmul casts of the kernels)
# ----------------------------------------------------------------------------
def gat_reference(x, adj, params, *, alpha):
    W, a = params["W"], params["a"]
    nheads = W.shape[0]
    heads = []
    for h in range(nheads):
        wh = x @ W[h]
        e = (x @ (W[h] @ a[h, 0]))[:, None] + (x @ (W[h] @ a[h, 1]))[None, :]
        e = jnp.where(e > 0, e, alpha * e)
        e = jnp.where(adj > 0, e, _NEG_INF)
        attn = jax.nn.softmax(e, axis=1)
        ho = jnp.dot(attn.astype(jnp.bfloat16),
                     wh.astype(jnp.bfloat16),
                     preferred_element_type=jnp.float32)
        heads.append(jax.nn.elu(ho))
    hcat = jnp.concatenate(heads, axis=1)
    z = jnp.dot(adj.astype(jnp.bfloat16),
                (hcat @ params["W_out"]).astype(jnp.bfloat16),
                preferred_element_type=jnp.float32) + params["b_out"]
    return jax.nn.log_softmax(jax.nn.elu(z), axis=1)


def init_params(key, nfeat, nhid, nclass, nheads):
    k1, k2, k3, k4 = jax.random.split(key, 4)
    W = jax.random.normal(k1, (nheads, nfeat, nhid), jnp.float32) * 0.1
    a = jax.random.normal(k2, (nheads, 2, nhid), jnp.float32) * 0.1
    W_out = jax.random.normal(k3, (nhid * nheads, nclass), jnp.float32) * 0.1
    b_out = jax.random.normal(k4, (1, nclass), jnp.float32) * 0.1
    return {"W": W, "a": a, "W_out": W_out, "b_out": b_out}


if __name__ == "__main__":
    # small shapes: N=256 nodes, nfeat=64, nhid=8, nheads=4, nclass=8
    N, nfeat, nhid, nclass, nheads = 256, 64, 8, 8, 4
    alpha = 0.2
    tile_n = 128  # 2 row tiles -> exercises the tiled / pipelined path

    key = jax.random.PRNGKey(0)
    kx, kadj, kp = jax.random.split(key, 3)

    x = jax.random.normal(kx, (N, nfeat), jnp.float32)
    # symmetric dense adjacency with self-loops
    a_rand = jax.random.uniform(kadj, (N, N), jnp.float32)
    adj = ((a_rand + a_rand.T) * 0.5 > 0.6).astype(jnp.float32)
    adj = jnp.maximum(adj, jnp.eye(N, dtype=jnp.float32))

    params = init_params(kp, nfeat, nhid, nclass, nheads)

    out = gat_forward(x, adj, params, alpha=alpha, tile_n=tile_n)
    out = jax.block_until_ready(out)

    assert out.shape == (N, nclass)
    # rows of log_softmax must sum (in prob space) to ~1
    assert bool(jnp.all(jnp.abs(jnp.sum(jnp.exp(out), axis=1) - 1.0) < 1e-4))
    # sanity check against the pure-JAX reference (loose tol covers the approx
    # reciprocal softmax and f32 matmul pass differences)
    ref = gat_reference(x, adj, params, alpha=alpha)
    max_err = float(jnp.max(jnp.abs(out - ref)))
    assert max_err < 0.3, f"mismatch vs reference: {max_err}"

    print("KERNEL_OK")
</pallas_src>

<mosaic_0001>
module attributes {stable_mosaic.version = 11 : i64} {
  func.func @_proj_kernel(%arg0: i32, %arg1: memref<128x64xf32, #tpu.memory_space<vmem>>, %arg2: memref<64x40xf32, #tpu.memory_space<vmem>>, %arg3: memref<4x128x8xbf16, #tpu.memory_space<vmem>>, %arg4: memref<4x128x1xf32, #tpu.memory_space<vmem>>, %arg5: memref<4x1x128xf32, #tpu.memory_space<vmem>>, %arg6: memref<128x40xf32, #tpu.memory_space<vmem>>) attributes {dimension_semantics = [#tpu.dimension_semantics<parallel>], iteration_bounds = array<i64: 2>, scalar_prefetch = 0 : i64, scratch_operands = 1 : i64, tpu.core_type = #tpu.core_type<tc>, window_params = [{transform_indices = @transform_0, window_bounds = array<i64: 128, 64>}, {pipeline_mode = #tpu.pipeline_mode<synchronous>, transform_indices = @transform_1, window_bounds = array<i64: 64, 40>}, {transform_indices = @transform_2, window_bounds = array<i64: 4, 128, 8>}, {transform_indices = @transform_3, window_bounds = array<i64: 4, 128, 1>}, {transform_indices = @transform_4, window_bounds = array<i64: 4, 1, 128>}]} {
    %c0 = arith.constant 0 : index
    %c0_0 = arith.constant 0 : index
    %0 = vector.load %arg1[%c0, %c0_0] : memref<128x64xf32, #tpu.memory_space<vmem>>, vector<128x64xf32>
    %c0_1 = arith.constant 0 : index
    %c0_2 = arith.constant 0 : index
    %1 = vector.load %arg2[%c0_1, %c0_2] : memref<64x40xf32, #tpu.memory_space<vmem>>, vector<64x40xf32>
    %cst = arith.constant dense<0.000000e+00> : vector<128x40xf32>
    %2 = tpu.matmul %0, %1, %cst {dimension_numbers = #tpu.dot_dimension_numbers<[1], [0], [0], [1], [0, 0, 1, 1], [], []>} : vector<128x64xf32>, vector<64x40xf32>, vector<128x40xf32> -> vector<128x40xf32>
    %c0_3 = arith.constant 0 : index
    %c0_4 = arith.constant 0 : index
    %3 = vector.load %arg6[%c0_3, %c0_4] : memref<128x40xf32, #tpu.memory_space<vmem>>, vector<128x40xf32>
    tpu.vector_store %arg6[%c0_3, %c0_4], %2 {strides = array<i32>} : memref<128x40xf32, #tpu.memory_space<vmem>>, vector<128x40xf32>,
    %c0_5 = arith.constant 0 : index
    %c0_6 = arith.constant 0 : index
    %4 = vector.load %arg6[%c0_5, %c0_6] : memref<128x40xf32, #tpu.memory_space<vmem>>, vector<128x8xf32>
    %5 = arith.truncf %4 : vector<128x8xf32> to vector<128x8xbf16>
    %c0_7 = arith.constant 0 : index
    %c0_8 = arith.constant 0 : index
    %c0_9 = arith.constant 0 : index
    %6 = vector.load %arg3[%c0_7, %c0_8, %c0_9] : memref<4x128x8xbf16, #tpu.memory_space<vmem>>, vector<1x128x8xbf16>
    %7 = vector.shape_cast %6 : vector<1x128x8xbf16> to vector<128x8xbf16>
    %8 = vector.shape_cast %5 : vector<128x8xbf16> to vector<1x128x8xbf16>
    tpu.vector_store %arg3[%c0_7, %c0_8, %c0_9], %8 {strides = array<i32>} : memref<4x128x8xbf16, #tpu.memory_space<vmem>>, vector<1x128x8xbf16>,
    %c0_10 = arith.constant 0 : index
    %c32 = arith.constant 32 : index
    %9 = vector.load %arg6[%c0_10, %c32] : memref<128x40xf32, #tpu.memory_space<vmem>>, vector<128x1xf32>
    %c0_11 = arith.constant 0 : index
    %c0_12 = arith.constant 0 : index
    %c0_13 = arith.constant 0 : index
    %10 = vector.load %arg4[%c0_11, %c0_12, %c0_13] : memref<4x128x1xf32, #tpu.memory_space<vmem>>, vector<1x128x1xf32>
    %11 = vector.shape_cast %10 : vector<1x128x1xf32> to vector<128x1xf32>
    %12 = vector.shape_cast %9 : vector<128x1xf32> to vector<1x128x1xf32>
    tpu.vector_store %arg4[%c0_11, %c0_12, %c0_13], %12 {strides = array<i32>} : memref<4x128x1xf32, #tpu.memory_space<vmem>>, vector<1x128x1xf32>,
    %c0_14 = arith.constant 0 : index
    %c36 = arith.constant 36 : index
    %13 = vector.load %arg6[%c0_14, %c36] : memref<128x40xf32, #tpu.memory_space<vmem>>, vector<128x1xf32>
    %14 = tpu.transpose %13, [1, 0] : vector<128x1xf32> -> vector<1x128xf32>
    %c0_15 = arith.constant 0 : index
    %c0_16 = arith.constant 0 : index
    %c0_17 = arith.constant 0 : index
    %15 = vector.load %arg5[%c0_15, %c0_16, %c0_17] : memref<4x1x128xf32, #tpu.memory_space<vmem>>, vector<1x1x128xf32>
    %16 = vector.shape_cast %15 : vector<1x1x128xf32> to vector<1x128xf32>
    %17 = vector.shape_cast %14 : vector<1x128xf32> to vector<1x1x128xf32>
    tpu.vector_store %arg5[%c0_15, %c0_16, %c0_17], %17 {strides = array<i32>} : memref<4x1x128xf32, #tpu.memory_space<vmem>>, vector<1x1x128xf32>,
    %c0_18 = arith.constant 0 : index
    %c8 = arith.constant 8 : index
    %18 = vector.load %arg6[%c0_18, %c8] : memref<128x40xf32, #tpu.memory_space<vmem>>, vector<128x8xf32>
    %19 = arith.truncf %18 : vector<128x8xf32> to vector<128x8xbf16>
    %c1 = arith.constant 1 : index
    %c0_19 = arith.constant 0 : index
    %c0_20 = arith.constant 0 : index
    %20 = vector.load %arg3[%c1, %c0_19, %c0_20] : memref<4x128x8xbf16, #tpu.memory_space<vmem>>, vector<1x128x8xbf16>
    %21 = vector.shape_cast %20 : vector<1x128x8xbf16> to vector<128x8xbf16>
    %22 = vector.shape_cast %19 : vector<128x8xbf16> to vector<1x128x8xbf16>
    tpu.vector_store %arg3[%c1, %c0_19, %c0_20], %22 {strides = array<i32>} : memref<4x128x8xbf16, #tpu.memory_space<vmem>>, vector<1x128x8xbf16>,
    %c0_21 = arith.constant 0 : index
    %c33 = arith.constant 33 : index
    %23 = vector.load %arg6[%c0_21, %c33] : memref<128x40xf32, #tpu.memory_space<vmem>>, vector<128x1xf32>
    %c1_22 = arith.constant 1 : index
    %c0_23 = arith.constant 0 : index
    %c0_24 = arith.constant 0 : index
    %24 = vector.load %arg4[%c1_22, %c0_23, %c0_24] : memref<4x128x1xf32, #tpu.memory_space<vmem>>, vector<1x128x1xf32>
    %25 = vector.shape_cast %24 : vector<1x128x1xf32> to vector<128x1xf32>
    %26 = vector.shape_cast %23 : vector<128x1xf32> to vector<1x128x1xf32>
    tpu.vector_store %arg4[%c1_22, %c0_23, %c0_24], %26 {strides = array<i32>} : memref<4x128x1xf32, #tpu.memory_space<vmem>>, vector<1x128x1xf32>,
    %c0_25 = arith.constant 0 : index
    %c37 = arith.constant 37 : index
    %27 = vector.load %arg6[%c0_25, %c37] : memref<128x40xf32, #tpu.memory_space<vmem>>, vector<128x1xf32>
    %28 = tpu.transpose %27, [1, 0] : vector<128x1xf32> -> vector<1x128xf32>
    %c1_26 = arith.constant 1 : index
    %c0_27 = arith.constant 0 : index
    %c0_28 = arith.constant 0 : index
    %29 = vector.load %arg5[%c1_26, %c0_27, %c0_28] : memref<4x1x128xf32, #tpu.memory_space<vmem>>, vector<1x1x128xf32>
    %30 = vector.shape_cast %29 : vector<1x1x128xf32> to vector<1x128xf32>
    %31 = vector.shape_cast %28 : vector<1x128xf32> to vector<1x1x128xf32>
    tpu.vector_store %arg5[%c1_26, %c0_27, %c0_28], %31 {strides = array<i32>} : memref<4x1x128xf32, #tpu.memory_space<vmem>>, vector<1x1x128xf32>,
    %c0_29 = arith.constant 0 : index
    %c16 = arith.constant 16 : index
    %32 = vector.load %arg6[%c0_29, %c16] : memref<128x40xf32, #tpu.memory_space<vmem>>, vector<128x8xf32>
    %33 = arith.truncf %32 : vector<128x8xf32> to vector<128x8xbf16>
    %c2 = arith.constant 2 : index
    %c0_30 = arith.constant 0 : index
    %c0_31 = arith.constant 0 : index
    %34 = vector.load %arg3[%c2, %c0_30, %c0_31] : memref<4x128x8xbf16, #tpu.memory_space<vmem>>, vector<1x128x8xbf16>
    %35 = vector.shape_cast %34 : vector<1x128x8xbf16> to vector<128x8xbf16>
    %36 = vector.shape_cast %33 : vector<128x8xbf16> to vector<1x128x8xbf16>
    tpu.vector_store %arg3[%c2, %c0_30, %c0_31], %36 {strides = array<i32>} : memref<4x128x8xbf16, #tpu.memory_space<vmem>>, vector<1x128x8xbf16>,
    %c0_32 = arith.constant 0 : index
    %c34 = arith.constant 34 : index
    %37 = vector.load %arg6[%c0_32, %c34] : memref<128x40xf32, #tpu.memory_space<vmem>>, vector<128x1xf32>
    %c2_33 = arith.constant 2 : index
    %c0_34 = arith.constant 0 : index
    %c0_35 = arith.constant 0 : index
    %38 = vector.load %arg4[%c2_33, %c0_34, %c0_35] : memref<4x128x1xf32, #tpu.memory_space<vmem>>, vector<1x128x1xf32>
    %39 = vector.shape_cast %38 : vector<1x128x1xf32> to vector<128x1xf32>
    %40 = vector.shape_cast %37 : vector<128x1xf32> to vector<1x128x1xf32>
    tpu.vector_store %arg4[%c2_33, %c0_34, %c0_35], %40 {strides = array<i32>} : memref<4x128x1xf32, #tpu.memory_space<vmem>>, vector<1x128x1xf32>,
    %c0_36 = arith.constant 0 : index
    %c38 = arith.constant 38 : index
    %41 = vector.load %arg6[%c0_36, %c38] : memref<128x40xf32, #tpu.memory_space<vmem>>, vector<128x1xf32>
    %42 = tpu.transpose %41, [1, 0] : vector<128x1xf32> -> vector<1x128xf32>
    %c2_37 = arith.constant 2 : index
    %c0_38 = arith.constant 0 : index
    %c0_39 = arith.constant 0 : index
    %43 = vector.load %arg5[%c2_37, %c0_38, %c0_39] : memref<4x1x128xf32, #tpu.memory_space<vmem>>, vector<1x1x128xf32>
    %44 = vector.shape_cast %43 : vector<1x1x128xf32> to vector<1x128xf32>
    %45 = vector.shape_cast %42 : vector<1x128xf32> to vector<1x1x128xf32>
    tpu.vector_store %arg5[%c2_37, %c0_38, %c0_39], %45 {strides = array<i32>} : memref<4x1x128xf32, #tpu.memory_space<vmem>>, vector<1x1x128xf32>,
    %c0_40 = arith.constant 0 : index
    %c24 = arith.constant 24 : index
    %46 = vector.load %arg6[%c0_40, %c24] : memref<128x40xf32, #tpu.memory_space<vmem>>, vector<128x8xf32>
    %47 = arith.truncf %46 : vector<128x8xf32> to vector<128x8xbf16>
    %c3 = arith.constant 3 : index
    %c0_41 = arith.constant 0 : index
    %c0_42 = arith.constant 0 : index
    %48 = vector.load %arg3[%c3, %c0_41, %c0_42] : memref<4x128x8xbf16, #tpu.memory_space<vmem>>, vector<1x128x8xbf16>
    %49 = vector.shape_cast %48 : vector<1x128x8xbf16> to vector<128x8xbf16>
    %50 = vector.shape_cast %47 : vector<128x8xbf16> to vector<1x128x8xbf16>
    tpu.vector_store %arg3[%c3, %c0_41, %c0_42], %50 {strides = array<i32>} : memref<4x128x8xbf16, #tpu.memory_space<vmem>>, vector<1x128x8xbf16>,
    %c0_43 = arith.constant 0 : index
    %c35 = arith.constant 35 : index
    %51 = vector.load %arg6[%c0_43, %c35] : memref<128x40xf32, #tpu.memory_space<vmem>>, vector<128x1xf32>
    %c3_44 = arith.constant 3 : index
    %c0_45 = arith.constant 0 : index
    %c0_46 = arith.constant 0 : index
    %52 = vector.load %arg4[%c3_44, %c0_45, %c0_46] : memref<4x128x1xf32, #tpu.memory_space<vmem>>, vector<1x128x1xf32>
    %53 = vector.shape_cast %52 : vector<1x128x1xf32> to vector<128x1xf32>
    %54 = vector.shape_cast %51 : vector<128x1xf32> to vector<1x128x1xf32>
    tpu.vector_store %arg4[%c3_44, %c0_45, %c0_46], %54 {strides = array<i32>} : memref<4x128x1xf32, #tpu.memory_space<vmem>>, vector<1x128x1xf32>,
    %c0_47 = arith.constant 0 : index
    %c39 = arith.constant 39 : index
    %55 = vector.load %arg6[%c0_47, %c39] : memref<128x40xf32, #tpu.memory_space<vmem>>, vector<128x1xf32>
    %56 = tpu.transpose %55, [1, 0] : vector<128x1xf32> -> vector<1x128xf32>
    %c3_48 = arith.constant 3 : index
    %c0_49 = arith.constant 0 : index
    %c0_50 = arith.constant 0 : index
    %57 = vector.load %arg5[%c3_48, %c0_49, %c0_50] : memref<4x1x128xf32, #tpu.memory_space<vmem>>, vector<1x1x128xf32>
    %58 = vector.shape_cast %57 : vector<1x1x128xf32> to vector<1x128xf32>
    %59 = vector.shape_cast %56 : vector<1x128xf32> to vector<1x1x128xf32>
    tpu.vector_store %arg5[%c3_48, %c0_49, %c0_50], %59 {strides = array<i32>} : memref<4x1x128xf32, #tpu.memory_space<vmem>>, vector<1x1x128xf32>,
    return
  }
  func.func @transform_0(%arg0: i32) -> (i32, i32) {
    %c0_i32 = arith.constant 0 : i32
    %c0_i32_0 = arith.constant 0 : i32
    return %arg0, %c0_i32 : i32, i32
  }
  func.func @transform_1(%arg0: i32) -> (i32, i32) {
    %c0_i32 = arith.constant 0 : i32
    %c0_i32_0 = arith.constant 0 : i32
    %c0_i32_1 = arith.constant 0 : i32
    return %c0_i32, %c0_i32_0 : i32, i32
  }
  func.func @transform_2(%arg0: i32) -> (i32, i32, i32) {
    %c0_i32 = arith.constant 0 : i32
    %c0_i32_0 = arith.constant 0 : i32
    %c0_i32_1 = arith.constant 0 : i32
    return %c0_i32, %arg0, %c0_i32_0 : i32, i32, i32
  }
  func.func @transform_3(%arg0: i32) -> (i32, i32, i32) {
    %c0_i32 = arith.constant 0 : i32
    %c0_i32_0 = arith.constant 0 : i32
    %c0_i32_1 = arith.constant 0 : i32
    return %c0_i32, %arg0, %c0_i32_0 : i32, i32, i32
  }
  func.func @transform_4(%arg0: i32) -> (i32, i32, i32) {
    %c0_i32 = arith.constant 0 : i32
    %c0_i32_0 = arith.constant 0 : i32
    %c0_i32_1 = arith.constant 0 : i32
    return %c0_i32, %c0_i32_0, %arg0 : i32, i32, i32
  }
}

</mosaic_0001>

<bundles_post_ra>
// kernel: tpu_custom_call.1
= control target key start
LH: loop header
LB: loop body
LE: loop exit
PB: predicated region body
PF: predicated region fallthrough
CT: control target
= control target key end

     0   :  { %10 = vsyncpa [#allocation6], 0  ;;  %s4241_s0 = inlined_call_operand.vmem [shape: f32[256,64], index: 0, kind: input, shape index: {}]   ;;  %s4242_s1 = inlined_call_operand.vmem [shape: f32[64,40], index: 1, kind: input, shape index: {}]   ;;  %s4243_s2 = inlined_call_operand.vmem [shape: bf16[4,256,8], index: 2, kind: output, shape index: {0}]   ;;  %s4244_s3 = inlined_call_operand.vmem [shape: f32[4,256,1], index: 3, kind: output, shape index: {1}]   ;;  %s4245_s4 = inlined_call_operand.hbm [shape: f32[4,1,256], index: 4, kind: output, shape index: {2}]  }
   0x1   :  { %12 = vsyncpa [#allocation6 + $0x1], 0  ;;  %s3010_s15 = smov 0   ;;  %s3012_s16 = smov 0  }
   0x2   :  { %s3014_s17 = smov 0   ;;  %s3016_s18 = smov 0  }
   0x3 LB: > { %s3031_s19 = sadd.s32 4294967295, %s2968_s18   ;;  %s2501_s20 = sadd.s32 4294967294, %s2968_s18   ;;  %s2968_s18 = sphi %s3016_s18, %s4251_s18   ;;  %s2964_s17 = sphi %s3014_s17, %s4250_s17   ;;  %s2960_s16 = sphi %s3012_s16, %s4249_s16   ;;  %s2956_s15 = sphi %s3010_s15, %s4248_s15  }
   0x4   : > { %s3035_s21 = sadd.s32 1, %s2968_s18   ;;  %s72_s22 = sadd.s32 1, %s2964_s17 }
   0x5   : > { %s69_s23 = ssub.s32 %s2968_s18, %s3035_s21  ;;  %p82_p0 = scmp.ne.s32.totalorder %s2964_s17, %s2960_s16 }
   0x6   : > { %p70_p1 = scmp.eq.s32.totalorder %s69_s23, 0  ;;  %p83_p2 = scmp.eq.s32.totalorder %s3031_s19, 1 }
   0x7   : > { %p140_p3 = scmp.ne.s32.totalorder %s2960_s16, %s2956_s15  ;;  %p141_p4 = scmp.eq.s32.totalorder %s2501_s20, 1 }
   0x8   : > { %s3046_s24 = scalar_select %p70_p1, %s2964_s17, %s72_s22  }
   0x9   : > { %p3048_p5 = por %p83_p2, %p82_p0  ;;  %p3052_p6 = por %p141_p4, %p140_p3 }
   0xa   : > { %p2504_p7 = scmp.ge.s32.totalorder %s2968_s18, 1  ;;  %p171_p8 = scmp.lt.s32.totalorder %s2968_s18, 3 }
   0xc   : > { %p172_p9 = pnand %p2504_p7, %p171_p8 }
   0xd   : > { %v229_v0 = vld [vmem:[%s4242_s1] sm:$0xff] (!%p172_p9)  ;;  %v230_v1 = vld [vmem:[%s4242_s1 + $0x8] sm:$0xff] (!%p172_p9)  ;;  %v231_v2 = vld [vmem:[%s4242_s1 + $0x10] sm:$0xff] (!%p172_p9)  ;;  %s3068_s7 = sshll.u32 (!%p172_p9), %s3031_s19, 4  ;;  %vm237_vm0 = vcmask (!%p172_p9), 523264   ;;  %vm431_vm1 = vcmask (!%p172_p9), 326656  }
   0xe   : > { %175 = sbr.rel (%p172_p9) target bundleno = 977 (0x3d1), region = 28  ;;  %v2829_v3 = vpack.c.bf16 (!%p172_p9), %v230_v1, %v229_v0  ;;  %v232_v4 = vld [vmem:[%s4242_s1 + $0x18] sm:$0xff] (!%p172_p9)  ;;  %p206_p10 = scmp.lt.s32.totalorder (!%p172_p9), %s3068_s7, 31  ;;  %v233_v6 = vld [vmem:[%s4242_s1 + $0x20] sm:$0xff] (!%p172_p9)  ;;  %v234_v7 = vld [vmem:[%s4242_s1 + $0x28] sm:$0xff] (!%p172_p9)  ;;  %vm528_vm2 = vcmask (!%p172_p9), 60416  }
   0xf   : > { %v2833_v5 = vpack.c.bf16 (!%p172_p9), %v232_v4, %v231_v2  ;;  %v2837_v8 = vpack.c.bf16 (!%p172_p9), %v234_v7, %v233_v6  ;;  %v235_v9 = vld [vmem:[%s4242_s1 + $0x30] sm:$0xff] (!%p172_p9)  ;;  %v236_v10 = vld [vmem:[%s4242_s1 + $0x38] sm:$0xff] (!%p172_p9)  ;;  %s3127_s6 = sand.u32 (!%p172_p9), 1, %s2960_s16   ;;  %s2970_s9 = smov (!%p172_p9), 96   ;;  %vm625_vm3 = vcmask (!%p172_p9), 7168  }
  0x10   : > { %2830 = vmatprep.subr.bf16.mxu0 (!%p172_p9), %v2829_v3  ;;  %2845 = vmatprep.subr.bf16.mxu1 (!%p172_p9), %v2829_v3  ;;  %v2841_v13 = vpack.c.bf16 (!%p172_p9), %v236_v10, %v235_v9  ;;  %s2505_s8 = sshll.u32 (!%p172_p9), %s3127_s6, 8  ;;  %s2971_s11 = smov (!%p172_p9), 92  }
  0x11   : > { %2832 = vmatpush3.bf16.msra.mxu0 (!%p172_p9), %v2829_v3  ;;  %2849 = vmatpush3.bf16.msra.mxu1 (!%p172_p9), %v2829_v3  ;;  %s3168_s10 = scalar_lea.vmem (!%p172_p9), [#allocation3], %s2505_s8  ;;  %s2972_s12 = smov (!%p172_p9), 95  }
  0x12   : > { %2834 = vmatprep.subr.bf16.mxu0 (!%p172_p9), %v2833_v5  ;;  %2846 = vmatprep.subr.bf16.mxu1 (!%p172_p9), %v2833_v5  ;;  %s2973_s13 = smov (!%p172_p9), 91   ;;  %s2976_s22 = smov (!%p172_p9), 94  }
  0x13   : > { %s2977_s23 = smov (!%p172_p9), 90   ;;  %s2506_s27 = sshll.u32 (!%p172_p9), %s3127_s6, 9 }
  0x14   : > { %s3407_s28 = scalar_lea.vmem (!%p172_p9), [#allocation4], %s2506_s27  ;;  %s2978_s29 = smov (!%p172_p9), 89  }
  0x15   : > { %s207_s14 = scalar_select %p206_p10, %s3068_s7, 31  ;;  %2836 = vmatpush3.bf16.msra.mxu0 %v2833_v5  ;;  %2850 = vmatpush3.bf16.msra.mxu1 %v2833_v5 }
  0x16   : > { %2838 = vmatprep.subr.bf16.mxu0 %v2837_v8  ;;  %2847 = vmatprep.subr.bf16.mxu1 %v2837_v8  ;;  %s2979_s30 = smov 93   ;;  %s2507_s8 = sshll.u32 %s3127_s6, 2 }
  0x17   : > { %s2509_s20 = sshll.u32 %s207_s14, 3  ;;  %s2974_s14 = smov 120  }
  0x18   : > { %s3090_s5 = scalar_lea.vmem %s4241_s0, %s2509_s20  ;;  %s2975_s20 = smov 112  }
  0x19   : > { %v213_v11 = vld [vmem:[%s3090_s5] sm:$0xff]  ;;  %2840 = vmatpush3.bf16.msra.mxu0 %v2837_v8  ;;  %2851 = vmatpush3.bf16.msra.mxu1 %v2837_v8  ;;  %v214_v14 = vld [vmem:[%s3090_s5 + $0x8] sm:$0xff]  ;;  %v223_v16 = vld [vmem:[%s3090_s5 + $0x50] sm:$0xff] }
  0x1a   : > { %v221_v12 = vld [vmem:[%s3090_s5 + $0x40] sm:$0xff]  ;;  %2805 = vmatprep.mubr.msk.f32.mxu0 %vm237_vm0, %v213_v11  ;;  %2842 = vmatprep.subr.bf16.mxu0 %v2841_v13  ;;  %v222_v15 = vld [vmem:[%s3090_s5 + $0x48] sm:$0xff]  ;;  %v215_v17 = vld [vmem:[%s3090_s5 + $0x10] sm:$0xff] }
  0x1b   : > { %2817 = vmatprep.mubr.msk.f32.mxu1 %vm237_vm0, %v221_v12  ;;  %2848 = vmatprep.subr.bf16.mxu1 %v2841_v13  ;;  %v224_v18 = vld [vmem:[%s3090_s5 + $0x58] sm:$0xff]  ;;  %v217_v20 = vld [vmem:[%s3090_s5 + $0x20] sm:$0xff]  ;;  %v218_v22 = vld [vmem:[%s3090_s5 + $0x28] sm:$0xff] }
  0x1c   : > { %v216_v19 = vld [vmem:[%s3090_s5 + $0x18] sm:$0xff]  ;;  %v225_v21 = vld [vmem:[%s3090_s5 + $0x60] sm:$0xff]  ;;  %v226_v23 = vld [vmem:[%s3090_s5 + $0x68] sm:$0xff] }
  0x1d   : > { %2844 = vmatpush3.bf16.msra.mxu0 %v2841_v13  ;;  %2852 = vmatpush3.bf16.msra.mxu1 %v2841_v13  ;;  %v219_v24 = vld [vmem:[%s3090_s5 + $0x30] sm:$0xff]  ;;  %v220_v26 = vld [vmem:[%s3090_s5 + $0x38] sm:$0xff] }
  0x1e   : > { %v227_v25 = vld [vmem:[%s3090_s5 + $0x70] sm:$0xff]  ;;  %v228_v27 = vld [vmem:[%s3090_s5 + $0x78] sm:$0xff]  ;;  %s2980_s5 = smov 104  }
  0x20   : > { %2806 = vmatmul.mubr.msk.f32.vlgmr.msra.gmra.mrb[0].mxu0 %vm237_vm0, %v214_v14  ;;  %2818 = vmatmul.mubr.msk.f32.vlgmr.msra.gmra.mrb[0].mxu1 %vm237_vm0, %v222_v15 }
  0x21   : > { %2820 = vmatprep.mubr.msk.f32.mxu1 %vm237_vm0, %v223_v16  ;;  %2808 = vmatprep.mubr.msk.f32.mxu0 %vm237_vm0, %v215_v17 }
  0x24   : > { %2821 = vmatmul.mubr.msk.f32.gmra.mrb[2].mxu1 %vm237_vm0, %v224_v18  ;;  %2809 = vmatmul.mubr.msk.f32.gmra.mrb[2].mxu0 %vm237_vm0, %v216_v19 }
  0x25   : > { %2811 = vmatprep.mubr.msk.f32.mxu0 %vm237_vm0, %v217_v20  ;;  %2823 = vmatprep.mubr.msk.f32.mxu1 %vm237_vm0, %v225_v21 }
  0x28   : > { %2812 = vmatmul.mubr.msk.f32.gmra.mrb[4].mxu0 %vm237_vm0, %v218_v22  ;;  %2824 = vmatmul.mubr.msk.f32.gmra.mrb[4].mxu1 %vm237_vm0, %v226_v23 }
  0x29   : > { %2814 = vmatprep.mubr.msk.f32.mxu0 %vm237_vm0, %v219_v24  ;;  %2826 = vmatprep.mubr.msk.f32.mxu1 %vm237_vm0, %v227_v25 }
  0x2c   : > { %2815 = vmatmul.mubr.msk.f32.gmra.mrb[6].mxu0 %vm237_vm0, %v220_v26  ;;  %2827 = vmatmul.mubr.msk.f32.gmra.mrb[6].mxu1 %vm237_vm0, %v228_v27 }
  0xf3   : > { %v2807_v28 = vpop.f32.mrb[0].mxu0  ;;  %v2819_v29 = vpop.f32.mrb[0].mxu1 }
  0xf4   : > { %433 = vst.msk [vmem:[#allocation2 + $0x8] sm:$0xff] %vm431_vm1, %v2807_v28  ;;  %441 = vst.msk [vmem:[#allocation2 + $0x48] sm:$0xff] %vm431_vm1, %v2819_v29  ;;  %v392_v30 = vpop.f32.mrb[1].mxu1  ;;  %v352_v31 = vpop.f32.mrb[1].mxu0 }
  0xf5   : > { %440 = vst.msk [vmem:[#allocation2 + $0x40] sm:$0xff] %vm431_vm1, %v392_v30  ;;  %432 = vst.msk [vmem:[#allocation2] sm:$0xff] %vm431_vm1, %v352_v31 }
  0xf7   : > { %v2822_v32 = vpop.f32.mrb[2].mxu1  ;;  %v2810_v33 = vpop.f32.mrb[2].mxu0 }
  0xf8   : > { %443 = vst.msk [vmem:[#allocation2 + $0x58] sm:$0xff] %vm431_vm1, %v2822_v32  ;;  %v402_v34 = vpop.f32.mrb[3].mxu1  ;;  %435 = vst.msk [vmem:[#allocation2 + $0x18] sm:$0xff] %vm431_vm1, %v2810_v33  ;;  %v362_v35 = vpop.f32.mrb[3].mxu0 }
  0xf9   : > { %442 = vst.msk [vmem:[#allocation2 + $0x50] sm:$0xff] %vm431_vm1, %v402_v34  ;;  %434 = vst.msk [vmem:[#allocation2 + $0x10] sm:$0xff] %vm431_vm1, %v362_v35 }
  0xfb   : > { %v3136_v36 = vld [vmem:[#allocation2 + $0x8] sm:$0xff]  ;;  %v2813_v38 = vpop.f32.mrb[4].mxu0  ;;  %v2825_v39 = vpop.f32.mrb[4].mxu1 }
  0xfc   : > { %v3138_v37 = vld [vmem:[#allocation2 + $0x48] sm:$0xff]  ;;  %v3142_v40 = vpack.c.bf16 %v3136_v36, %v3136_v36  ;;  %v3148_v42 = vld [vmem:[#allocation2 + $0x40] sm:$0xff]  ;;  %579 = vrot.lane.b32.xlu0 %v3136_v36, %s2970_s9  ;;  %437 = vst.msk [vmem:[#allocation2 + $0x28] sm:$0xff] %vm431_vm1, %v2813_v38  ;;  %v372_v44 = vpop.f32.mrb[5].mxu0  ;;  %445 = vst.msk [vmem:[#allocation2 + $0x68] sm:$0xff] %vm431_vm1, %v2825_v39  ;;  %v412_v45 = vpop.f32.mrb[5].mxu1 }
  0xfd   : > { %v3146_v41 = vpack.c.bf16 %v3138_v37, %v3138_v37  ;;  %v3150_v43 = vld [vmem:[#allocation2] sm:$0xff]  ;;  %595 = vrot.lane.b32.xlu1 %v3138_v37, %s2970_s9  ;;  %v3160_v46 = vpack.c.bf16 %v3148_v42, %v3148_v42  ;;  %436 = vst.msk [vmem:[#allocation2 + $0x20] sm:$0xff] %vm431_vm1, %v372_v44  ;;  %444 = vst.msk [vmem:[#allocation2 + $0x60] sm:$0xff] %vm431_vm1, %v412_v45 }
  0xfe   : > { %v3164_v47 = vpack.c.bf16 %v3150_v43, %v3150_v43  ;;  %530 = vst.msk [vmem:[%s3168_s10 + $0x4] sm:$0xf] %vm528_vm2, %v3142_v40 }
  0xff   : > { %538 = vst.msk [vmem:[%s3168_s10 + $0x24] sm:$0xf] %vm528_vm2, %v3146_v41  ;;  %537 = vst.msk [vmem:[%s3168_s10 + $0x20] sm:$0xf] %vm528_vm2, %v3160_v46  ;;  %v3182_v48 = vld [vmem:[#allocation2 + $0x58] sm:$0xff]  ;;  %v2816_v50 = vpop.f32.mrb[6].mxu0 }
 0x100   : > { %529 = vst.msk [vmem:[%s3168_s10] sm:$0xf] %vm528_vm2, %v3164_v47  ;;  %v3184_v49 = vld [vmem:[#allocation2 + $0x18] sm:$0xff]  ;;  %v2828_v51 = vpop.f32.mrb[6].mxu1  ;;  %577 = vrot.lane.b32.xlu0 %v3150_v43, %s2970_s9  ;;  %v3192_v52 = vpack.c.bf16 %v3182_v48, %v3182_v48  ;;  %v3194_v53 = vld [vmem:[#allocation2 + $0x50] sm:$0xff]  ;;  %v382_v56 = vpop.f32.mrb[7].mxu0 }
 0x101   : > { %676 = vrot.lane.b32.xlu1 %v3136_v36, %s2971_s11  ;;  %v3198_v54 = vpack.c.bf16 %v3184_v49, %v3184_v49  ;;  %v3200_v55 = vld [vmem:[#allocation2 + $0x10] sm:$0xff]  ;;  %439 = vst.msk [vmem:[#allocation2 + $0x38] sm:$0xff] %vm431_vm1, %v2816_v50  ;;  %447 = vst.msk [vmem:[#allocation2 + $0x78] sm:$0xff] %vm431_vm1, %v2828_v51  ;;  %v422_v57 = vpop.f32.mrb[7].mxu1  ;;  %v3206_v58 = vpack.c.bf16 %v3194_v53, %v3194_v53 }
 0x102   : > { %v3210_v59 = vpack.c.bf16 %v3200_v55, %v3200_v55  ;;  %438 = vst.msk [vmem:[#allocation2 + $0x30] sm:$0xff] %vm431_vm1, %v382_v56  ;;  %446 = vst.msk [vmem:[#allocation2 + $0x70] sm:$0xff] %vm431_vm1, %v422_v57 }
 0x103   : > { %540 = vst.msk [vmem:[%s3168_s10 + $0x2c] sm:$0xf] %vm528_vm2, %v3192_v52  ;;  %532 = vst.msk [vmem:[%s3168_s10 + $0xc] sm:$0xf] %vm528_vm2, %v3198_v54  ;;  %v3226_v60 = vld [vmem:[#allocation2 + $0x28] sm:$0xff] }
 0x104   : > { %539 = vst.msk [vmem:[%s3168_s10 + $0x28] sm:$0xf] %vm528_vm2, %v3206_v58  ;;  %531 = vst.msk [vmem:[%s3168_s10 + $0x8] sm:$0xf] %vm528_vm2, %v3210_v59  ;;  %v3228_v61 = vld [vmem:[#allocation2 + $0x68] sm:$0xff]  ;;  %593 = vrot.lane.b32.xlu0 %v3148_v42, %s2970_s9  ;;  %v3236_v62 = vpack.c.bf16 %v3226_v60, %v3226_v60  ;;  %v3238_v63 = vld [vmem:[#allocation2 + $0x20] sm:$0xff] }
 0x105   : > { %692 = vrot.lane.b32.xlu1 %v3138_v37, %s2971_s11  ;;  %v3242_v0 = vpack.c.bf16 %v3228_v61, %v3228_v61  ;;  %v3244_v1 = vld [vmem:[#allocation2 + $0x60] sm:$0xff]  ;;  %v3248_v2 = vpack.c.bf16 %v3238_v63, %v3238_v63 }
 0x106   : > { %v3252_v3 = vpack.c.bf16 %v3244_v1, %v3244_v1  ;;  %534 = vst.msk [vmem:[%s3168_s10 + $0x14] sm:$0xf] %vm528_vm2, %v3236_v62 }
 0x107   : > { %542 = vst.msk [vmem:[%s3168_s10 + $0x34] sm:$0xf] %vm528_vm2, %v3242_v0  ;;  %533 = vst.msk [vmem:[%s3168_s10 + $0x10] sm:$0xf] %vm528_vm2, %v3248_v2 }
 0x108   : > { %541 = vst.msk [vmem:[%s3168_s10 + $0x30] sm:$0xf] %vm528_vm2, %v3252_v3  ;;  %v3266_v4 = vld [vmem:[#allocation2 + $0x38] sm:$0xff]  ;;  %674 = vrot.lane.b32.xlu0 %v3150_v43, %s2971_s11 }
 0x109   : > { %v3268_v5 = vld [vmem:[#allocation2 + $0x78] sm:$0xff]  ;;  %918 = vrot.lane.b32.xlu1 %v3136_v36, %s2972_s12  ;;  %v3276_v6 = vpack.c.bf16 %v3266_v4, %v3266_v4  ;;  %v3278_v7 = vld [vmem:[#allocation2 + $0x30] sm:$0xff] }
 0x10a   : > { %v3282_v8 = vpack.c.bf16 %v3268_v5, %v3268_v5  ;;  %v3284_v9 = vld [vmem:[#allocation2 + $0x70] sm:$0xff]  ;;  %v3288_v10 = vpack.c.bf16 %v3278_v7, %v3278_v7 }
 0x10b   : > { %v3292_v11 = vpack.c.bf16 %v3284_v9, %v3284_v9  ;;  %536 = vst.msk [vmem:[%s3168_s10 + $0x1c] sm:$0xf] %vm528_vm2, %v3276_v6 }
 0x10c   : > { %544 = vst.msk [vmem:[%s3168_s10 + $0x3c] sm:$0xf] %vm528_vm2, %v3282_v8  ;;  %535 = vst.msk [vmem:[%s3168_s10 + $0x18] sm:$0xf] %vm528_vm2, %v3288_v10  ;;  %690 = vrot.lane.b32.xlu0 %v3148_v42, %s2971_s11 }
 0x10d   : > { %543 = vst.msk [vmem:[%s3168_s10 + $0x38] sm:$0xf] %vm528_vm2, %v3292_v11  ;;  %934 = vrot.lane.b32.xlu1 %v3138_v37, %s2972_s12 }
 0x110   : > { %1029 = vrot.lane.b32.xlu0 %v3148_v42, %s2973_s13 }
 0x111   : > { %1015 = vrot.lane.b32.xlu1 %v3136_v36, %s2973_s13 }
 0x114   : > { %597 = vrot.lane.b32.xlu0 %v3194_v53, %s2970_s9 }
 0x115   : > { %1031 = vrot.lane.b32.xlu1 %v3138_v37, %s2973_s13 }
 0x118   : > { %678 = vrot.lane.b32.xlu0 %v3200_v55, %s2971_s11 }
 0x119   : > { %916 = vrot.lane.b32.xlu1 %v3150_v43, %s2972_s12 }
 0x11c   : > { %694 = vrot.lane.b32.xlu0 %v3194_v53, %s2971_s11 }
 0x11d   : > { %932 = vrot.lane.b32.xlu1 %v3148_v42, %s2972_s12 }
 0x120   : > { %1017 = vrot.lane.b32.xlu0 %v3200_v55, %s2973_s13 }
 0x121   : > { %1013 = vrot.lane.b32.xlu1 %v3150_v43, %s2973_s13 }
 0x124   : > { %1033 = vrot.lane.b32.xlu0 %v3194_v53, %s2973_s13 }
 0x125   : > { %821 = vrot.lane.b32.xlu1 %v3142_v40, %s2974_s14 }
 0x128   : > { %585 = vrot.lane.b32.xlu0 %v3238_v63, %s2970_s9 }
 0x129   : > { %837 = vrot.lane.b32.xlu1 %v3146_v41, %s2974_s14 }
 0x12c   : > { %601 = vrot.lane.b32.xlu0 %v3244_v1, %s2970_s9 }
 0x12d   : > { %1161 = vrot.lane.b32.xlu1 %v3142_v40, %s2975_s20 }
 0x130   : > { %682 = vrot.lane.b32.xlu0 %v3238_v63, %s2971_s11 }
 0x131   : > { %819 = vrot.lane.b32.xlu1 %v3164_v47, %s2974_s14 }
 0x134   : > { %698 = vrot.lane.b32.xlu0 %v3244_v1, %s2971_s11 }
 0x135   : > { %835 = vrot.lane.b32.xlu1 %v3160_v46, %s2974_s14 }
 0x138   : > { %1021 = vrot.lane.b32.xlu0 %v3238_v63, %s2973_s13 }
 0x139   : > { %1159 = vrot.lane.b32.xlu1 %v3164_v47, %s2975_s20 }
 0x13c   : > { %1037 = vrot.lane.b32.xlu0 %v3244_v1, %s2973_s13 }
 0x13d   : > { %583 = vrot.lane.b32.xlu1 %v3184_v49, %s2970_s9 }
 0x140   : > { %930 = vrot.lane.b32.xlu0 %v3266_v4, %s2972_s12 }
 0x141   : > { %599 = vrot.lane.b32.xlu1 %v3182_v48, %s2970_s9 }
 0x144   : > { %589 = vrot.lane.b32.xlu0 %v3278_v7, %s2970_s9 }
 0x145   : > { %680 = vrot.lane.b32.xlu1 %v3184_v49, %s2971_s11 }
 0x148   : > { %605 = vrot.lane.b32.xlu0 %v3284_v9, %s2970_s9 }
 0x149   : > { %696 = vrot.lane.b32.xlu1 %v3182_v48, %s2971_s11 }
 0x14c   : > { %686 = vrot.lane.b32.xlu0 %v3278_v7, %s2971_s11 }
 0x14d   : > { %922 = vrot.lane.b32.xlu1 %v3184_v49, %s2972_s12 }
 0x150   : > { %702 = vrot.lane.b32.xlu0 %v3284_v9, %s2971_s11 }
 0x151   : > { %938 = vrot.lane.b32.xlu1 %v3182_v48, %s2972_s12 }
 0x154   : > { %1025 = vrot.lane.b32.xlu0 %v3278_v7, %s2973_s13 }
 0x155   : > { %1019 = vrot.lane.b32.xlu1 %v3184_v49, %s2973_s13 }
 0x158   : > { %1041 = vrot.lane.b32.xlu0 %v3284_v9, %s2973_s13 }
 0x159   : > { %1035 = vrot.lane.b32.xlu1 %v3182_v48, %s2973_s13 }
 0x15c   : > { %1270 = vrot.lane.b32.xlu0 %v3266_v4, %s2976_s22 }
 0x15d   : > { %581 = vrot.lane.b32.xlu1 %v3200_v55, %s2970_s9 }
 0x160   : > { %1357 = vrot.lane.b32.xlu0 %v3200_v55, %s2977_s23 }
 0x161   : > { %920 = vrot.lane.b32.xlu1 %v3200_v55, %s2972_s12 }
 0x164   : > { %1361 = vrot.lane.b32.xlu0 %v3238_v63, %s2977_s23 }
 0x165   : > { %936 = vrot.lane.b32.xlu1 %v3194_v53, %s2972_s12 }
 0x168   : > { %1365 = vrot.lane.b32.xlu0 %v3278_v7, %s2977_s23 }
 0x169   : > { %825 = vrot.lane.b32.xlu1 %v3198_v54, %s2974_s14 }
 0x16c   : > { %1369 = vrot.lane.b32.xlu0 %v3148_v42, %s2977_s23 }
 0x16d   : > { %841 = vrot.lane.b32.xlu1 %v3192_v52, %s2974_s14 }
 0x16e   : > { %v580_v13 = vpop.permute.xlu0 %579 }
 0x16f   : > { %v596_v12 = vpop.permute.xlu1 %595  ;;  %627 = vst.msk [vmem:[%s3407_s28 + $0x8] sm:$0xff] %vm625_vm3, %v580_v13 }
 0x170   : > { %635 = vst.msk [vmem:[%s3407_s28 + $0x48] sm:$0xff] %vm625_vm3, %v596_v12  ;;  %1373 = vrot.lane.b32.xlu0 %v3194_v53, %s2977_s23 }
 0x171   : > { %1165 = vrot.lane.b32.xlu1 %v3198_v54, %s2975_s20 }
 0x172   : > { %v578_v15 = vpop.permute.xlu0 %577 }
 0x173   : > { %v3417_v14 = vpop.permute.xlu1 %676  ;;  %626 = vst.msk [vmem:[%s3407_s28] sm:$0xff] %vm625_vm3, %v578_v15 }
 0x174   : > { %1377 = vrot.lane.b32.xlu0 %v3244_v1, %s2977_s23 }
 0x175   : > { %823 = vrot.lane.b32.xlu1 %v3210_v59, %s2974_s14 }
 0x176   : > { %v594_v17 = vpop.permute.xlu0 %593 }
 0x177   : > { %v3425_v16 = vpop.permute.xlu1 %692  ;;  %634 = vst.msk [vmem:[%s3407_s28 + $0x40] sm:$0xff] %vm625_vm3, %v594_v17 }
 0x178   : > { %1381 = vrot.lane.b32.xlu0 %v3284_v9, %s2977_s23 }
 0x179   : > { %839 = vrot.lane.b32.xlu1 %v3206_v58, %s2974_s14 }
 0x17a   : > { %v3433_v19 = vpop.permute.xlu0 %674 }
 0x17b   : > { %v919_v18 = vpop.permute.xlu1 %918 }
 0x17c   : > { %2575 = vst.msk [vmem:[%s3407_s28 + $0x88] sm:$0xff] %vm625_vm3, %v919_v18  ;;  %1719 = vrot.lane.b32.xlu0 %v3228_v61, %s2978_s29 }
 0x17d   : > { %1163 = vrot.lane.b32.xlu1 %v3210_v59, %s2975_s20 }
 0x17e   : > { %v3441_v21 = vpop.permute.xlu0 %690 }
 0x17f   : > { %v935_v20 = vpop.permute.xlu1 %934 }
 0x180   : > { %2583 = vst.msk [vmem:[%s3407_s28 + $0xc8] sm:$0xff] %vm625_vm3, %v935_v20  ;;  %1600 = vrot.lane.b32.xlu0 %v3200_v55, %s2979_s30 }
 0x181   : > { %587 = vrot.lane.b32.xlu1 %v3226_v60, %s2970_s9 }
 0x182   : > { %v3451_v23 = vpop.permute.xlu0 %1029 }
 0x183   : > { %v3449_v22 = vpop.permute.xlu1 %1015 }
 0x184   : > { %1604 = vrot.lane.b32.xlu0 %v3238_v63, %s2979_s30 }
 0x185   : > { %603 = vrot.lane.b32.xlu1 %v3228_v61, %s2970_s9 }
 0x186   : > { %v598_v25 = vpop.permute.xlu0 %597 }
 0x187   : > { %v3457_v24 = vpop.permute.xlu1 %1031  ;;  %636 = vst.msk [vmem:[%s3407_s28 + $0x50] sm:$0xff] %vm625_vm3, %v598_v25 }
 0x188   : > { %1608 = vrot.lane.b32.xlu0 %v3278_v7, %s2979_s30 }
 0x189   : > { %684 = vrot.lane.b32.xlu1 %v3226_v60, %s2971_s11 }
 0x18a   : > { %v679_v27 = vpop.permute.xlu0 %678 }
 0x18b   : > { %v917_v26 = vpop.permute.xlu1 %916 }
 0x18c   : > { %2574 = vst.msk [vmem:[%s3407_s28 + $0x80] sm:$0xff] %vm625_vm3, %v917_v26  ;;  %1612 = vrot.lane.b32.xlu0 %v3148_v42, %s2979_s30 }
 0x18d   : > { %700 = vrot.lane.b32.xlu1 %v3228_v61, %s2971_s11 }
 0x18e   : > { %v3471_v29 = vpop.permute.xlu0 %694 }
 0x18f   : > { %v933_v28 = vpop.permute.xlu1 %932 }
 0x190   : > { %2582 = vst.msk [vmem:[%s3407_s28 + $0xc0] sm:$0xff] %vm625_vm3, %v933_v28  ;;  %1616 = vrot.lane.b32.xlu0 %v3194_v53, %s2979_s30 }
 0x191   : > { %926 = vrot.lane.b32.xlu1 %v3226_v60, %s2972_s12 }
 0x192   : > { %v3481_v31 = vpop.permute.xlu0 %1017 }
 0x193   : > { %v3479_v30 = vpop.permute.xlu1 %1013 }
 0x194   : > { %1620 = vrot.lane.b32.xlu0 %v3244_v1, %s2979_s30 }
 0x195   : > { %942 = vrot.lane.b32.xlu1 %v3228_v61, %s2972_s12 }
 0x196   : > { %v3487_v33 = vpop.permute.xlu0 %1033 }
 0x197   : > { %v822_v32 = vpop.permute.xlu1 %821 }
 0x198   : > { %2559 = vst.msk [vmem:[%s3168_s10 + $0x44] sm:$0xf] %vm528_vm2, %v822_v32  ;;  %1624 = vrot.lane.b32.xlu0 %v3284_v9, %s2979_s30 }
 0x199   : > { %1023 = vrot.lane.b32.xlu1 %v3226_v60, %s2973_s13 }
 0x19a   : > { %v586_v35 = vpop.permute.xlu0 %585 }
 0x19b   : > { %v838_v34 = vpop.permute.xlu1 %837  ;;  %630 = vst.msk [vmem:[%s3407_s28 + $0x20] sm:$0xff] %vm625_vm3, %v586_v35 }
 0x19c   : > { %2567 = vst.msk [vmem:[%s3168_s10 + $0x64] sm:$0xf] %vm528_vm2, %v838_v34 }
 0x19d   : > { %1039 = vrot.lane.b32.xlu1 %v3228_v61, %s2973_s13 }
 0x19e   : > { %v602_v38 = vpop.permute.xlu0 %601 }
 0x19f   : > { %v1162_v37 = vpop.permute.xlu1 %1161  ;;  %638 = vst.msk [vmem:[%s3407_s28 + $0x60] sm:$0xff] %vm625_vm3, %v602_v38 }
 0x1a0   : > { %2608 = vst.msk [vmem:[%s3168_s10 + $0x84] sm:$0xf] %vm528_vm2, %v1162_v37 }
 0x1a1   : > { %924 = vrot.lane.b32.xlu1 %v3238_v63, %s2972_s12 }
 0x1a2   : > { %v683_v40 = vpop.permute.xlu0 %682 }
 0x1a3   : > { %v820_v39 = vpop.permute.xlu1 %819 }
 0x1a4   : > { %2558 = vst.msk [vmem:[%s3168_s10 + $0x40] sm:$0xf] %vm528_vm2, %v820_v39 }
 0x1a5   : > { %940 = vrot.lane.b32.xlu1 %v3244_v1, %s2972_s12 }
 0x1a6   : > { %v3511_v45 = vpop.permute.xlu0 %698 }
 0x1a7   : > { %v836_v44 = vpop.permute.xlu1 %835 }
 0x1a8   : > { %2566 = vst.msk [vmem:[%s3168_s10 + $0x60] sm:$0xf] %vm528_vm2, %v836_v44 }
 0x1a9   : > { %829 = vrot.lane.b32.xlu1 %v3236_v62, %s2974_s14 }
 0x1aa   : > { %v3517_v50 = vpop.permute.xlu0 %1021 }
 0x1ab   : > { %v1160_v47 = vpop.permute.xlu1 %1159 }
 0x1ac   : > { %2607 = vst.msk [vmem:[%s3168_s10 + $0x80] sm:$0xf] %vm528_vm2, %v1160_v47 }
 0x1ad   : > { %845 = vrot.lane.b32.xlu1 %v3242_v0, %s2974_s14 }
 0x1ae   : > { %v3523_v54 = vpop.permute.xlu0 %1037 }
 0x1af   : > { %v584_v51 = vpop.permute.xlu1 %583 }
 0x1b0   : > { %629 = vst.msk [vmem:[%s3407_s28 + $0x18] sm:$0xff] %vm625_vm3, %v584_v51 }
 0x1b1   : > { %1169 = vrot.lane.b32.xlu1 %v3236_v62, %s2975_s20 }
 0x1b2   : > { %v931_v57 = vpop.permute.xlu0 %930 }
 0x1b3   : > { %v600_v56 = vpop.permute.xlu1 %599  ;;  %2581 = vst.msk [vmem:[%s3407_s28 + $0xb8] sm:$0xff] %vm625_vm3, %v931_v57 }
 0x1b4   : > { %637 = vst.msk [vmem:[%s3407_s28 + $0x58] sm:$0xff] %vm625_vm3, %v600_v56 }
 0x1b5   : > { %827 = vrot.lane.b32.xlu1 %v3248_v2, %s2974_s14 }
 0x1b6   : > { %722 = vxpose.xlu0.b32.start [1/16] (narrow) %v3433_v19, 8  ;;  %v590_v12 = vpop.permute.xlu0 %589 }
 0x1b7   : > { %v681_v59 = vpop.permute.xlu1 %680  ;;  %632 = vst.msk [vmem:[%s3407_s28 + $0x30] sm:$0xff] %vm625_vm3, %v590_v12 }
 0x1b9   : > { %843 = vrot.lane.b32.xlu1 %v3252_v3, %s2974_s14 }
 0x1ba   : > { %723 = vxpose.xlu0.b32.cont [2/16] (narrow) %v3417_v14, 8  ;;  %v606_v13 = vpop.permute.xlu0 %605 }
 0x1bb   : > { %v3540_v62 = vpop.permute.xlu1 %696  ;;  %640 = vst.msk [vmem:[%s3407_s28 + $0x70] sm:$0xff] %vm625_vm3, %v606_v13 }
 0x1bd   : > { %1167 = vrot.lane.b32.xlu1 %v3248_v2, %s2975_s20 }
 0x1be   : > { %724 = vxpose.xlu0.b32.cont [3/16] (narrow) %v679_v27, 8  ;;  %v3547_v17 = vpop.permute.xlu0 %686 }
 0x1bf   : > { %v923_v15 = vpop.permute.xlu1 %922 }
 0x1c0   : > { %2577 = vst.msk [vmem:[%s3407_s28 + $0x98] sm:$0xff] %vm625_vm3, %v923_v15 }
 0x1c1   : > { %591 = vrot.lane.b32.xlu1 %v3266_v4, %s2970_s9 }
 0x1c2   : > { %725 = vxpose.xlu0.b32.cont [4/16] (narrow) %v681_v59, 8  ;;  %v3553_v14 = vpop.permute.xlu0 %702 }
 0x1c3   : > { %v939_v18 = vpop.permute.xlu1 %938 }
 0x1c4   : > { %2585 = vst.msk [vmem:[%s3407_s28 + $0xd8] sm:$0xff] %vm625_vm3, %v939_v18 }
 0x1c5   : > { %607 = vrot.lane.b32.xlu1 %v3268_v5, %s2970_s9  ;;  %s3933_s9 = scalar_lea.vmem [#allocation5], %s2507_s8 }
 0x1c6   : > { %v3561_v19 = vpop.permute.xlu0 %1025  ;;  %726 = vxpose.xlu0.b32.cont [5/16] (narrow) %v683_v40, 8 }
 0x1c7   : > { %v3559_v2 = vpop.permute.xlu1 %1019 }
 0x1c9   : > { %688 = vrot.lane.b32.xlu1 %v3266_v4, %s2971_s11 }
 0x1ca   : > { %v3567_v25 = vpop.permute.xlu0 %1041 }
 0x1cb   : > { %v3565_v20 = vpop.permute.xlu1 %1035 }
 0x1cd   : > { %704 = vrot.lane.b32.xlu1 %v3268_v5, %s2971_s11  ;;  %s1784_s11 = scalar_lea.sflag [#allocation6], %s3127_s6 }
 0x1ce   : > { %v1271_v27 = vpop.permute.xlu0 %1270 }
 0x1cf   : > { %v582_v26 = vpop.permute.xlu1 %581  ;;  %2630 = vst.msk [vmem:[%s3407_s28 + $0x138] sm:$0xff] %vm625_vm3, %v1271_v27 }
 0x1d0   : > { %628 = vst.msk [vmem:[%s3407_s28 + $0x10] sm:$0xff] %vm625_vm3, %v582_v26 }
 0x1d1   : > { %946 = vrot.lane.b32.xlu1 %v3268_v5, %s2972_s12 }
 0x1d2   : > { %v3577_v32 = vpop.permute.xlu0 %1357 }
 0x1d3   : > { %v921_v28 = vpop.permute.xlu1 %920 }
 0x1d4   : > { %2576 = vst.msk [vmem:[%s3407_s28 + $0x90] sm:$0xff] %vm625_vm3, %v921_v28 }
 0x1d5   : > { %1027 = vrot.lane.b32.xlu1 %v3266_v4, %s2973_s13 }
 0x1d6   : > { %v3583_v35 = vpop.permute.xlu0 %1361 }
 0x1d7   : > { %v937_v34 = vpop.permute.xlu1 %936 }
 0x1d8   : > { %2584 = vst.msk [vmem:[%s3407_s28 + $0xd0] sm:$0xff] %vm625_vm3, %v937_v34 }
 0x1d9   : > { %1043 = vrot.lane.b32.xlu1 %v3268_v5, %s2973_s13 }
 0x1da   : > { %v3589_v38 = vpop.permute.xlu0 %1365 }
 0x1db   : > { %v826_v37 = vpop.permute.xlu1 %825 }
 0x1dc   : > { %2561 = vst.msk [vmem:[%s3168_s10 + $0x4c] sm:$0xf] %vm528_vm2, %v826_v37 }
 0x1dd   : > { %928 = vrot.lane.b32.xlu1 %v3278_v7, %s2972_s12 }
 0x1de   : > { %v3595_v40 = vpop.permute.xlu0 %1369 }
 0x1df   : > { %v842_v39 = vpop.permute.xlu1 %841 }
 0x1e0   : > { %2569 = vst.msk [vmem:[%s3168_s10 + $0x6c] sm:$0xf] %vm528_vm2, %v842_v39 }
 0x1e1   : > { %944 = vrot.lane.b32.xlu1 %v3284_v9, %s2972_s12  ;;  %s2763_s12 = sshll.u32 (%p3048_p5), %s3031_s19, 6 }
 0x1e2   : > { %v3601_v47 = vpop.permute.xlu0 %1373 }
 0x1e3   : > { %v1166_v44 = vpop.permute.xlu1 %1165 }
 0x1e4   : > { %2610 = vst.msk [vmem:[%s3168_s10 + $0x8c] sm:$0xf] %vm528_vm2, %v1166_v44 }
 0x1e5   : > { %833 = vrot.lane.b32.xlu1 %v3276_v6, %s2974_s14 }
 0x1e6   : > { %v3607_v56 = vpop.permute.xlu0 %1377 }
 0x1e7   : > { %v824_v51 = vpop.permute.xlu1 %823 }
 0x1e8   : > { %2560 = vst.msk [vmem:[%s3168_s10 + $0x48] sm:$0xf] %vm528_vm2, %v824_v51 }
 0x1e9   : > { %849 = vrot.lane.b32.xlu1 %v3282_v8, %s2974_s14 }
 0x1ea   : > { %v3613_v59 = vpop.permute.xlu0 %1381 }
 0x1eb   : > { %v840_v57 = vpop.permute.xlu1 %839 }
 0x1ec   : > { %2568 = vst.msk [vmem:[%s3168_s10 + $0x68] sm:$0xf] %vm528_vm2, %v840_v57 }
 0x1ed   : > { %1173 = vrot.lane.b32.xlu1 %v3276_v6, %s2975_s20 }
 0x1ee   : > { %v3619_v13 = vpop.permute.xlu0 %1719 }
 0x1ef   : > { %v1164_v12 = vpop.permute.xlu1 %1163 }
 0x1f0   : > { %2609 = vst.msk [vmem:[%s3168_s10 + $0x88] sm:$0xf] %vm528_vm2, %v1164_v12 }
 0x1f1   : > { %831 = vrot.lane.b32.xlu1 %v3288_v10, %s2974_s14 }
 0x1f2   : > { %v1601_v18 = vpop.permute.xlu0 %1600 }
 0x1f3   : > { %v588_v15 = vpop.permute.xlu1 %587  ;;  %2674 = vst.msk [vmem:[%s3407_s28 + $0x190] sm:$0xff] %vm625_vm3, %v1601_v18  ;;  %v3710_v18 = vld [vmem:[#allocation2 + $0x48] sm:$0xff] }
 0x1f4   : > { %631 = vst.msk [vmem:[%s3407_s28 + $0x28] sm:$0xff] %vm625_vm3, %v588_v15 }
 0x1f5   : > { %847 = vrot.lane.b32.xlu1 %v3292_v11, %s2974_s14 }
 0x1f6   : > { %v1605_v27 = vpop.permute.xlu0 %1604 }
 0x1f7   : > { %v604_v26 = vpop.permute.xlu1 %603  ;;  %2676 = vst.msk [vmem:[%s3407_s28 + $0x1a0] sm:$0xff] %vm625_vm3, %v1605_v27 }
 0x1f8   : > { %639 = vst.msk [vmem:[%s3407_s28 + $0x68] sm:$0xff] %vm625_vm3, %v604_v26 }
 0x1f9   : > { %1171 = vrot.lane.b32.xlu1 %v3288_v10, %s2975_s20 }
 0x1fa   : > { %v1609_v34 = vpop.permute.xlu0 %1608 }
 0x1fb   : > { %v685_v28 = vpop.permute.xlu1 %684  ;;  %2678 = vst.msk [vmem:[%s3407_s28 + $0x1b0] sm:$0xff] %vm625_vm3, %v1609_v34 }
 0x1fc   : > { %727 = vxpose.xlu0.b32.cont [6/16] (narrow) %v685_v28, 8  ;;  %v3804_v28 = vld [vmem:[#allocation2 + $0x18] sm:$0xff] }
 0x1fd   : > { %1175 = vrot.lane.b32.xlu1 %v3160_v46, %s2975_s20 }
 0x1fe   : > { %v1613_v39 = vpop.permute.xlu0 %1612 }
 0x1ff   : > { %v3641_v37 = vpop.permute.xlu1 %700  ;;  %2680 = vst.msk [vmem:[%s3407_s28 + $0x1c0] sm:$0xff] %vm625_vm3, %v1613_v39 }
 0x200   : > { %728 = vxpose.xlu0.b32.cont [7/16] (narrow) %v3547_v17, 8 }
 0x201   : > { %1177 = vrot.lane.b32.xlu1 %v3146_v41, %s2975_s20 }
 0x202   : > { %v1617_v51 = vpop.permute.xlu0 %1616 }
 0x203   : > { %v927_v44 = vpop.permute.xlu1 %926  ;;  %2682 = vst.msk [vmem:[%s3407_s28 + $0x1d0] sm:$0xff] %vm625_vm3, %v1617_v51 }
 0x204   : > { %2579 = vst.msk [vmem:[%s3407_s28 + $0xa8] sm:$0xff] %vm625_vm3, %v927_v44  ;;  %v3816_v44 = vld [vmem:[#allocation2 + $0x28] sm:$0xff] }
 0x205   : > { %1179 = vrot.lane.b32.xlu1 %v3206_v58, %s2975_s20 }
 0x206   : > { %v1621_v57 = vpop.permute.xlu0 %1620 }
 0x207   : > { %v943_v46 = vpop.permute.xlu1 %942  ;;  %2684 = vst.msk [vmem:[%s3407_s28 + $0x1e0] sm:$0xff] %vm625_vm3, %v1621_v57  ;;  %v1443_v57 = vld [vmem:[#allocation2 + $0x40] sm:$0xff] }
 0x208   : > { %2587 = vst.msk [vmem:[%s3407_s28 + $0xe8] sm:$0xff] %vm625_vm3, %v943_v46  ;;  %v2752_v46 = vpack.c.bf16 %v3816_v44, %v3816_v44 }
 0x209   : > { %1181 = vrot.lane.b32.xlu1 %v3192_v52, %s2975_s20 }
 0x20a   : > { %v1625_v17 = vpop.permute.xlu0 %1624 }
 0x20b   : > { %v3660_v41 = vpop.permute.xlu1 %1023  ;;  %2686 = vst.msk [vmem:[%s3407_s28 + $0x1f0] sm:$0xff] %vm625_vm3, %v1625_v17 }
 0x20d   : > { %1183 = vrot.lane.b32.xlu1 %v3252_v3, %s2975_s20 }
 0x20f   : > { %v3666_v58 = vpop.permute.xlu1 %1039 }
 0x211   : > { %1185 = vrot.lane.b32.xlu1 %v3242_v0, %s2975_s20 }
 0x213   : > { %v925_v12 = vpop.permute.xlu1 %924 }
 0x214   : > { %2578 = vst.msk [vmem:[%s3407_s28 + $0xa0] sm:$0xff] %vm625_vm3, %v925_v12 }
 0x215   : > { %1187 = vrot.lane.b32.xlu1 %v3292_v11, %s2975_s20 }
 0x217   : > { %v941_v52 = vpop.permute.xlu1 %940 }
 0x218   : > { %2586 = vst.msk [vmem:[%s3407_s28 + $0xe0] sm:$0xff] %vm625_vm3, %v941_v52 }
 0x219   : > { %1189 = vrot.lane.b32.xlu1 %v3282_v8, %s2975_s20  ;;  %s3993_s20 = scalar_lea.vmem (%p3048_p5), %s4243_s2, %s2763_s12 }
 0x21b   : > { %v830_v3 = vpop.permute.xlu1 %829 }
 0x21c   : > { %2563 = vst.msk [vmem:[%s3168_s10 + $0x54] sm:$0xf] %vm528_vm2, %v830_v3  ;;  %v1667_v3 = vld [vmem:[#allocation2 + $0x30] sm:$0xff] }
 0x21d   : > { %1256 = vrot.lane.b32.xlu1 %v3150_v43, %s2976_s22 }
 0x21f   : > { %v846_v0 = vpop.permute.xlu1 %845 }
 0x220   : > { %2571 = vst.msk [vmem:[%s3168_s10 + $0x74] sm:$0xf] %vm528_vm2, %v846_v0 }
 0x221   : > { %1258 = vrot.lane.b32.xlu1 %v3136_v36, %s2976_s22 }
 0x223   : > { %v1170_v11 = vpop.permute.xlu1 %1169 }
 0x224   : > { %2612 = vst.msk [vmem:[%s3168_s10 + $0x94] sm:$0xf] %vm528_vm2, %v1170_v11  ;;  %v3866_v11 = vld [vmem:[#allocation2 + $0x38] sm:$0xff] }
 0x225   : > { %1260 = vrot.lane.b32.xlu1 %v3200_v55, %s2976_s22 }
 0x227   : > { %v828_v8 = vpop.permute.xlu1 %827 }
 0x228   : > { %2562 = vst.msk [vmem:[%s3168_s10 + $0x50] sm:$0xf] %vm528_vm2, %v828_v8 }
 0x229   : > { %1262 = vrot.lane.b32.xlu1 %v3184_v49, %s2976_s22 }
 0x22b   : > { %v844_v43 = vpop.permute.xlu1 %843 }
 0x22c   : > { %2570 = vst.msk [vmem:[%s3168_s10 + $0x70] sm:$0xf] %vm528_vm2, %v844_v43 }
 0x22d   : > { %1264 = vrot.lane.b32.xlu1 %v3238_v63, %s2976_s22 }
 0x22f   : > { %v1168_v36 = vpop.permute.xlu1 %1167 }
 0x230   : > { %2611 = vst.msk [vmem:[%s3168_s10 + $0x90] sm:$0xf] %vm528_vm2, %v1168_v36 }
 0x231   : > { %1266 = vrot.lane.b32.xlu1 %v3226_v60, %s2976_s22 }
 0x233   : > { %v592_v55 = vpop.permute.xlu1 %591 }
 0x234   : > { %633 = vst.msk [vmem:[%s3407_s28 + $0x38] sm:$0xff] %vm625_vm3, %v592_v55  ;;  %v1671_v55 = vld [vmem:[#allocation2 + $0x50] sm:$0xff] }
 0x235   : > { %1268 = vrot.lane.b32.xlu1 %v3278_v7, %s2976_s22 }
 0x237   : > { %v608_v15 = vpop.permute.xlu1 %607 }
 0x238   : > { %641 = vst.msk [vmem:[%s3407_s28 + $0x78] sm:$0xff] %vm625_vm3, %v608_v15 }
 0x239   : > { %1272 = vrot.lane.b32.xlu1 %v3148_v42, %s2976_s22 }
 0x23b   : > { %v689_v63 = vpop.permute.xlu1 %688 }
 0x23c   : > { %729 = vxpose.xlu0.b32.cont [8/16] (narrow) %v689_v63, 8 }
 0x23d   : > { %1274 = vrot.lane.b32.xlu1 %v3710_v18, %s2976_s22 }
 0x23f   : > { %v705_v26 = vpop.permute.xlu1 %704 }
 0x240   : > { %730 = vxpose.xlu0.b32.cont [9/16] (narrow) %v3441_v21, 8 }
 0x241   : > { %1276 = vrot.lane.b32.xlu1 %v3194_v53, %s2976_s22 }
 0x243   : > { %v947_v7 = vpop.permute.xlu1 %946 }
 0x244   : > { %2589 = vst.msk [vmem:[%s3407_s28 + $0xf8] sm:$0xff] %vm625_vm3, %v947_v7  ;;  %731 = vxpose.xlu0.b32.cont [10/16] (narrow) %v3425_v16, 8  ;;  %v3743_v16 = vld [vmem:[#allocation2] sm:$0xff] }
 0x245   : > { %1278 = vrot.lane.b32.xlu1 %v3182_v48, %s2976_s22 }
 0x247   : > { %v1028_v42 = vpop.permute.xlu1 %1027 }
 0x248   : > { %732 = vxpose.xlu0.b32.cont [11/16] (narrow) %v3471_v29, 8  ;;  %v3749_v29 = vld [vmem:[#allocation2 + $0x8] sm:$0xff] }
 0x249   : > { %1280 = vrot.lane.b32.xlu1 %v3244_v1, %s2976_s22 }
 0x24b   : > { %v3725_v21 = vpop.permute.xlu1 %1043 }
 0x24c   : > { %733 = vxpose.xlu0.b32.cont [12/16] (narrow) %v3540_v62, 8 }
 0x24d   : > { %1282 = vrot.lane.b32.xlu1 %v3228_v61, %s2976_s22 }
 0x24f   : > { %v929_v53 = vpop.permute.xlu1 %928 }
 0x250   : > { %2580 = vst.msk [vmem:[%s3407_s28 + $0xb0] sm:$0xff] %vm625_vm3, %v929_v53  ;;  %734 = vxpose.xlu0.b32.cont [13/16] (narrow) %v3511_v45, 8  ;;  %v3885_v53 = vld [vmem:[#allocation2 + $0x78] sm:$0xff] }
 0x251   : > { %1284 = vrot.lane.b32.xlu1 %v3284_v9, %s2976_s22 }
 0x253   : > { %v945_v48 = vpop.permute.xlu1 %944 }
 0x254   : > { %2588 = vst.msk [vmem:[%s3407_s28 + $0xf0] sm:$0xff] %vm625_vm3, %v945_v48  ;;  %735 = vxpose.xlu0.b32.cont [14/16] (narrow) %v3641_v37, 8  ;;  %v2750_v37 = vpack.c.bf16 %v3804_v28, %v3804_v28 }
 0x255   : > { %1286 = vrot.lane.b32.xlu1 %v3268_v5, %s2976_s22 }
 0x257   : > { %v834_v1 = vpop.permute.xlu1 %833 }
 0x258   : > { %2565 = vst.msk [vmem:[%s3168_s10 + $0x5c] sm:$0xf] %vm528_vm2, %v834_v1  ;;  %736 = vxpose.xlu0.b32.cont [15/16] (narrow) %v3553_v14, 8  ;;  %v2756_v1 = vpack.c.bf16 %v3710_v18, %v3710_v18 }
 0x259   : > { %1353 = vrot.lane.b32.xlu1 %v3743_v16, %s2977_s23 }
 0x25b   : > { %v850_v9 = vpop.permute.xlu1 %849 }
 0x25c   : > { %2573 = vst.msk [vmem:[%s3168_s10 + $0x7c] sm:$0xf] %vm528_vm2, %v850_v9  ;;  %737 = vxpose.xlu0.b32.end [16/16] (narrow) %v705_v26, 8  ;;  %v1673_v26 = vld [vmem:[#allocation2 + $0x60] sm:$0xff] }
 0x25d   : > { %1355 = vrot.lane.b32.xlu1 %v3749_v29, %s2977_s23 }
 0x25f   : > { %v1174_v45 = vpop.permute.xlu1 %1173 }
 0x260   : > { %2614 = vst.msk [vmem:[%s3168_s10 + $0x9c] sm:$0xf] %vm528_vm2, %v1174_v45  ;;  %1061 = vxpose.xlu0.b32.start [1/16] (narrow) %v3479_v30, 8 }
 0x261   : > { %1359 = vrot.lane.b32.xlu1 %v3184_v49, %s2977_s23 }
 0x263   : > { %v832_v62 = vpop.permute.xlu1 %831 }
 0x264   : > { %2564 = vst.msk [vmem:[%s3168_s10 + $0x58] sm:$0xf] %vm528_vm2, %v832_v62  ;;  %1062 = vxpose.xlu0.b32.cont [2/16] (narrow) %v3449_v22, 8 }
 0x265   : > { %1363 = vrot.lane.b32.xlu1 %v3226_v60, %s2977_s23  ;;  %v3776_v60 = vld [vmem:[#allocation2 + $0x58] sm:$0xff] }
 0x266   : > { %v2758_v62 = vpack.c.bf16 %v3776_v60, %v3776_v60 }
 0x267   : > { %v848_v14 = vpop.permute.xlu1 %847 }
 0x268   : > { %2572 = vst.msk [vmem:[%s3168_s10 + $0x78] sm:$0xf] %vm528_vm2, %v848_v14  ;;  %1063 = vxpose.xlu0.b32.cont [3/16] (narrow) %v3481_v31, 8 }
 0x269   : > { %1367 = vrot.lane.b32.xlu1 %v3266_v4, %s2977_s23 }
 0x26b   : > { %v1172_v30 = vpop.permute.xlu1 %1171 }
 0x26c   : > { %2613 = vst.msk [vmem:[%s3168_s10 + $0x98] sm:$0xf] %vm528_vm2, %v1172_v30  ;;  %1064 = vxpose.xlu0.b32.cont [4/16] (narrow) %v3559_v2, 8  ;;  %v2748_v2 = vpack.c.bf16 %v3749_v29, %v3749_v29  ;;  %v2759_v30 = vpack.c.bf16 %v1673_v26, %v1673_v26 }
 0x26d   : > { %1371 = vrot.lane.b32.xlu1 %v3710_v18, %s2977_s23 }
 0x26f   : > { %v1176_v49 = vpop.permute.xlu1 %1175 }
 0x270   : > { %2615 = vst.msk [vmem:[%s3168_s10 + $0xa0] sm:$0xf] %vm528_vm2, %v1176_v49  ;;  %1065 = vxpose.xlu0.b32.cont [5/16] (narrow) %v3517_v50, 8  ;;  %v2747_v50 = vpack.c.bf16 %v3743_v16, %v3743_v16 }
 0x271   : > { %1375 = vrot.lane.b32.xlu1 %v3776_v60, %s2977_s23 }
 0x273   : > { %v1178_v4 = vpop.permute.xlu1 %1177 }
 0x274   : > { %2616 = vst.msk [vmem:[%s3168_s10 + $0xa4] sm:$0xf] %vm528_vm2, %v1178_v4  ;;  %1066 = vxpose.xlu0.b32.cont [6/16] (narrow) %v3660_v41, 8  ;;  %v2755_v41 = vpack.c.bf16 %v1443_v57, %v1443_v57 }
 0x275   : > { %1379 = vrot.lane.b32.xlu1 %v3228_v61, %s2977_s23 }
 0x277   : > { %v1180_v22 = vpop.permute.xlu1 %1179 }
 0x278   : > { %2617 = vst.msk [vmem:[%s3168_s10 + $0xa8] sm:$0xf] %vm528_vm2, %v1180_v22  ;;  %1067 = vxpose.xlu0.b32.cont [7/16] (narrow) %v3561_v19, 8 }
 0x279   : > { %1383 = vrot.lane.b32.xlu1 %v3268_v5, %s2977_s23  ;;  %v1437_v5 = vld [vmem:[#allocation2 + $0x10] sm:$0xff] }
 0x27a   : > { %v2749_v27 = vpack.c.bf16 %v1437_v5, %v1437_v5 }
 0x27b   : > { %v1182_v31 = vpop.permute.xlu1 %1181 }
 0x27c   : > { %2618 = vst.msk [vmem:[%s3168_s10 + $0xac] sm:$0xf] %vm528_vm2, %v1182_v31  ;;  %1068 = vxpose.xlu0.b32.cont [8/16] (narrow) %v1028_v42, 8  ;;  %v1675_v42 = vld [vmem:[#allocation2 + $0x70] sm:$0xff] }
 0x27d   : > { %1499 = vrot.lane.b32.xlu1 %v2747_v50, %s2980_s5  ;;  %v2761_v31 = vpack.c.bf16 %v1675_v42, %v1675_v42  ;;  %v2762_v50 = vpack.c.bf16 %v3885_v53, %v3885_v53 }
 0x27f   : > { %v1184_v61 = vpop.permute.xlu1 %1183 }
 0x280   : > { %2619 = vst.msk [vmem:[%s3168_s10 + $0xb0] sm:$0xf] %vm528_vm2, %v1184_v61  ;;  %1069 = vxpose.xlu0.b32.cont [9/16] (narrow) %v3451_v23, 8  ;;  %v1439_v23 = vld [vmem:[#allocation2 + $0x20] sm:$0xff] }
 0x281   : > { %1501 = vrot.lane.b32.xlu1 %v2748_v2, %s2980_s5 }
 0x283   : > { %v1186_v19 = vpop.permute.xlu1 %1185 }
 0x284   : > { %2620 = vst.msk [vmem:[%s3168_s10 + $0xb4] sm:$0xf] %vm528_vm2, %v1186_v19  ;;  %1070 = vxpose.xlu0.b32.cont [10/16] (narrow) %v3457_v24, 8  ;;  %v2751_v24 = vpack.c.bf16 %v1439_v23, %v1439_v23 }
 0x285   : > { %1503 = vrot.lane.b32.xlu1 %v2749_v27, %s2980_s5 }
 0x287   : > { %v1188_v34 = vpop.permute.xlu1 %1187 }
 0x288   : > { %2621 = vst.msk [vmem:[%s3168_s10 + $0xb8] sm:$0xf] %vm528_vm2, %v1188_v34  ;;  %1071 = vxpose.xlu0.b32.cont [11/16] (narrow) %v3487_v33, 8 }
 0x289   : > { %1505 = vrot.lane.b32.xlu1 %v2750_v37, %s2980_s5 }
 0x28b   : > { %v1190_v39 = vpop.permute.xlu1 %1189 }
 0x28c   : > { %2622 = vst.msk [vmem:[%s3168_s10 + $0xbc] sm:$0xf] %vm528_vm2, %v1190_v39  ;;  %1072 = vxpose.xlu0.b32.cont [12/16] (narrow) %v3565_v20, 8 }
 0x28d   : > { %1507 = vrot.lane.b32.xlu1 %v2751_v24, %s2980_s5 }
 0x28f   : > { %v1257_v51 = vpop.permute.xlu1 %1256 }
 0x290   : > { %2623 = vst.msk [vmem:[%s3407_s28 + $0x100] sm:$0xff] %vm625_vm3, %v1257_v51  ;;  %1073 = vxpose.xlu0.b32.cont [13/16] (narrow) %v3523_v54, 8 }
 0x291   : > { %1509 = vrot.lane.b32.xlu1 %v2752_v46, %s2980_s5 }
 0x293   : > { %v1259_v33 = vpop.permute.xlu1 %1258 }
 0x294   : > { %2624 = vst.msk [vmem:[%s3407_s28 + $0x108] sm:$0xff] %vm625_vm3, %v1259_v33  ;;  %1074 = vxpose.xlu0.b32.cont [14/16] (narrow) %v3666_v58, 8 }
 0x295   : > { %1511 = vrot.lane.b32.xlu1 %v3288_v10, %s2980_s5 }
 0x297   : > { %v1261_v20 = vpop.permute.xlu1 %1260 }
 0x298   : > { %2625 = vst.msk [vmem:[%s3407_s28 + $0x110] sm:$0xff] %vm625_vm3, %v1261_v20  ;;  %1075 = vxpose.xlu0.b32.cont [15/16] (narrow) %v3567_v25, 8 }
 0x299   : > { %1513 = vrot.lane.b32.xlu1 %v3276_v6, %s2980_s5 }
 0x29b   : > { %v1263_v54 = vpop.permute.xlu1 %1262 }
 0x29c   : > { %2626 = vst.msk [vmem:[%s3407_s28 + $0x118] sm:$0xff] %vm625_vm3, %v1263_v54  ;;  %1076 = vxpose.xlu0.b32.end [16/16] (narrow) %v3725_v21, 8 }
 0x29d   : > { %1515 = vrot.lane.b32.xlu1 %v2755_v41, %s2980_s5 }
 0x29f   : > { %v1265_v10 = vpop.permute.xlu1 %1264 }
 0x2a0   : > { %2627 = vst.msk [vmem:[%s3407_s28 + $0x120] sm:$0xff] %vm625_vm3, %v1265_v10 }
 0x2a1   : > { %1693 = vrot.lane.b32.xlu1 %v3743_v16, %s2978_s29 }
 0x2a3   : > { %v1267_v25 = vpop.permute.xlu1 %1266 }
 0x2a4   : > { %2628 = vst.msk [vmem:[%s3407_s28 + $0x128] sm:$0xff] %vm625_vm3, %v1267_v25 }
 0x2a5   : > { %1695 = vrot.lane.b32.xlu1 %v3749_v29, %s2978_s29 }
 0x2a7   : > { %v1269_v6 = vpop.permute.xlu1 %1268 }
 0x2a8   : > { %2629 = vst.msk [vmem:[%s3407_s28 + $0x130] sm:$0xff] %vm625_vm3, %v1269_v6 }
 0x2a9   : > { %1697 = vrot.lane.b32.xlu1 %v1437_v5, %s2978_s29 }
 0x2ab   : > { %v1273_v17 = vpop.permute.xlu1 %1272 }
 0x2ac   : > { %2631 = vst.msk [vmem:[%s3407_s28 + $0x140] sm:$0xff] %vm625_vm3, %v1273_v17 }
 0x2ad   : > { %1699 = vrot.lane.b32.xlu1 %v3804_v28, %s2978_s29 }
 0x2af   : > { %v1275_v58 = vpop.permute.xlu1 %1274 }
 0x2b0   : > { %2632 = vst.msk [vmem:[%s3407_s28 + $0x148] sm:$0xff] %vm625_vm3, %v1275_v58 }
 0x2b1   : > { %1701 = vrot.lane.b32.xlu1 %v1439_v23, %s2978_s29 }
 0x2b3   : > { %v1277_v12 = vpop.permute.xlu1 %1276 }
 0x2b4   : > { %2633 = vst.msk [vmem:[%s3407_s28 + $0x150] sm:$0xff] %vm625_vm3, %v1277_v12 }
 0x2b5   : > { %1703 = vrot.lane.b32.xlu1 %v3816_v44, %s2978_s29 }
 0x2b7   : > { %v1279_v52 = vpop.permute.xlu1 %1278 }
 0x2b8   : > { %2634 = vst.msk [vmem:[%s3407_s28 + $0x158] sm:$0xff] %vm625_vm3, %v1279_v52 }
 0x2b9   : > { %1705 = vrot.lane.b32.xlu1 %v1667_v3, %s2978_s29 }
 0x2bb   : > { %v1281_v0 = vpop.permute.xlu1 %1280 }
 0x2bc   : > { %2635 = vst.msk [vmem:[%s3407_s28 + $0x160] sm:$0xff] %vm625_vm3, %v1281_v0 }
 0x2bd   : > { %1707 = vrot.lane.b32.xlu1 %v3866_v11, %s2978_s29 }
 0x2bf   : > { %v1283_v8 = vpop.permute.xlu1 %1282 }
 0x2c0   : > { %2636 = vst.msk [vmem:[%s3407_s28 + $0x168] sm:$0xff] %vm625_vm3, %v1283_v8 }
 0x2c1   : > { %1709 = vrot.lane.b32.xlu1 %v1443_v57, %s2978_s29 }
 0x2c3   : > { %v1285_v43 = vpop.permute.xlu1 %1284 }
 0x2c4   : > { %2637 = vst.msk [vmem:[%s3407_s28 + $0x170] sm:$0xff] %vm625_vm3, %v1285_v43 }
 0x2c5   : > { %1711 = vrot.lane.b32.xlu1 %v3710_v18, %s2978_s29 }
 0x2c7   : > { %v1287_v36 = vpop.permute.xlu1 %1286 }
 0x2c8   : > { %2638 = vst.msk [vmem:[%s3407_s28 + $0x178] sm:$0xff] %vm625_vm3, %v1287_v36 }
 0x2c9   : > { %1713 = vrot.lane.b32.xlu1 %v1671_v55, %s2978_s29 }
 0x2cb   : > { %v1354_v15 = vpop.permute.xlu1 %1353 }
 0x2cc   : > { %1401 = vxpose.xlu0.b32.start [1/16] (narrow) %v1354_v15, 8  ;;  %v1809_v15 = vld [vmem:[%s3168_s10] sm:$0xff] (%p3048_p5)  }
 0x2cd   : > { %1715 = vrot.lane.b32.xlu1 %v3776_v60, %s2978_s29  ;;  %1810 = vst [vmem:[%s3993_s20] sm:$0xff] (%p3048_p5), %v1809_v15  }
 0x2cf   : > { %v1356_v63 = vpop.permute.xlu1 %1355 }
 0x2d0   : > { %1402 = vxpose.xlu0.b32.cont [2/16] (narrow) %v1356_v63, 8  ;;  %v1813_v63 = vld [vmem:[%s3168_s10 + $0x8] sm:$0xff] (%p3048_p5)  }
 0x2d1   : > { %1717 = vrot.lane.b32.xlu1 %v1673_v26, %s2978_s29  ;;  %v1817_v26 = vld [vmem:[%s3168_s10 + $0x10] sm:$0xff] (%p3048_p5)   ;;  %1814 = vst [vmem:[%s3993_s20 + $0x8] sm:$0xff] (%p3048_p5), %v1813_v63  }
 0x2d2   : > { %1818 = vst [vmem:[%s3993_s20 + $0x10] sm:$0xff] (%p3048_p5), %v1817_v26  }
 0x2d3   : > { %v1360_v7 = vpop.permute.xlu1 %1359 }
 0x2d4   : > { %1403 = vxpose.xlu0.b32.cont [3/16] (narrow) %v3577_v32, 8  ;;  %v2757_v32 = vpack.c.bf16 %v1671_v55, %v1671_v55 }
 0x2d5   : > { %1721 = vrot.lane.b32.xlu1 %v1675_v42, %s2978_s29  ;;  %v1825_v42 = vld [vmem:[%s3168_s10 + $0x20] sm:$0xff] (%p3048_p5)  }
 0x2d6   : > { %1826 = vst [vmem:[%s3993_s20 + $0x20] sm:$0xff] (%p3048_p5), %v1825_v42  }
 0x2d7   : > { %v1364_v21 = vpop.permute.xlu1 %1363 }
 0x2d8   : > { %1404 = vxpose.xlu0.b32.cont [4/16] (narrow) %v1360_v7, 8  ;;  %v1821_v7 = vld [vmem:[%s3168_s10 + $0x18] sm:$0xff] (%p3048_p5)  }
 0x2d9   : > { %1723 = vrot.lane.b32.xlu1 %v3885_v53, %s2978_s29  ;;  %1822 = vst [vmem:[%s3993_s20 + $0x18] sm:$0xff] (%p3048_p5), %v1821_v7  }
 0x2db   : > { %v1368_v48 = vpop.permute.xlu1 %1367 }
 0x2dc   : > { %1405 = vxpose.xlu0.b32.cont [5/16] (narrow) %v3583_v35, 8  ;;  %v1448_v35 = vld [vmem:[#allocation2 + $0x68] sm:$0xff] }
 0x2dd   : > { %1517 = vrot.lane.b32.xlu1 %v2756_v1, %s2980_s5  ;;  %v2760_v4 = vpack.c.bf16 %v1448_v35, %v1448_v35  ;;  %v1841_v1 = vld [vmem:[%s3168_s10 + $0x40] sm:$0xff] (%p3048_p5)  }
 0x2de   : > { %1842 = vst [vmem:[%s3993_s20 + $0x80] sm:$0xff] (%p3048_p5), %v1841_v1  }
 0x2df   : > { %v1372_v9 = vpop.permute.xlu1 %1371 }
 0x2e0   : > { %1406 = vxpose.xlu0.b32.cont [6/16] (narrow) %v1364_v21, 8  ;;  %v1829_v21 = vld [vmem:[%s3168_s10 + $0x28] sm:$0xff] (%p3048_p5)  }
 0x2e1   : > { %1519 = vrot.lane.b32.xlu1 %v2757_v32, %s2980_s5  ;;  %1830 = vst [vmem:[%s3993_s20 + $0x28] sm:$0xff] (%p3048_p5), %v1829_v21   ;;  %v1849_v32 = vld [vmem:[%s3168_s10 + $0x50] sm:$0xff] (%p3048_p5)  }
 0x2e2   : > { %1850 = vst [vmem:[%s3993_s20 + $0x90] sm:$0xff] (%p3048_p5), %v1849_v32  }
 0x2e3   : > { %v1376_v45 = vpop.permute.xlu1 %1375 }
 0x2e4   : > { %1407 = vxpose.xlu0.b32.cont [7/16] (narrow) %v3589_v38, 8 }
 0x2e5   : > { %1521 = vrot.lane.b32.xlu1 %v2758_v62, %s2980_s5  ;;  %v1857_v62 = vld [vmem:[%s3168_s10 + $0x60] sm:$0xff] (%p3048_p5)  }
 0x2e6   : > { %1858 = vst [vmem:[%s3993_s20 + $0xa0] sm:$0xff] (%p3048_p5), %v1857_v62  }
 0x2e7   : > { %v1380_v14 = vpop.permute.xlu1 %1379 }
 0x2e8   : > { %1408 = vxpose.xlu0.b32.cont [8/16] (narrow) %v1368_v48, 8  ;;  %v1837_v48 = vld [vmem:[%s3168_s10 + $0x38] sm:$0xff] (%p3048_p5)  }
 0x2e9   : > { %1523 = vrot.lane.b32.xlu1 %v2759_v30, %s2980_s5  ;;  %1838 = vst [vmem:[%s3993_s20 + $0x38] sm:$0xff] (%p3048_p5), %v1837_v48   ;;  %v1865_v30 = vld [vmem:[%s3168_s10 + $0x70] sm:$0xff] (%p3048_p5)  }
 0x2ea   : > { %1866 = vst [vmem:[%s3993_s20 + $0xb0] sm:$0xff] (%p3048_p5), %v1865_v30  }
 0x2eb   : > { %v1384_v49 = vpop.permute.xlu1 %1383 }
 0x2ec   : > { %1409 = vxpose.xlu0.b32.cont [9/16] (narrow) %v3595_v40, 8 }
 0x2ed   : > { %1525 = vrot.lane.b32.xlu1 %v2760_v4, %s2980_s5  ;;  %v1877_v4 = vld [vmem:[%s3168_s10 + $0x88] sm:$0xff] (%p3048_p5)  }
 0x2ee   : > { %1878 = vst [vmem:[%s3993_s20 + $0x108] sm:$0xff] (%p3048_p5), %v1877_v4  }
 0x2ef   : > { %v1500_v22 = vpop.permute.xlu1 %1499 }
 0x2f0   : > { %2656 = vst.msk [vmem:[%s3168_s10 + $0xc0] sm:$0xf] %vm528_vm2, %v1500_v22  ;;  %1410 = vxpose.xlu0.b32.cont [10/16] (narrow) %v1372_v9, 8  ;;  %v1845_v9 = vld [vmem:[%s3168_s10 + $0x48] sm:$0xff] (%p3048_p5)   ;;  %v1881_v22 = vld [vmem:[%s3168_s10 + $0x90] sm:$0xff] (%p3048_p5)  }
 0x2f1   : > { %1527 = vrot.lane.b32.xlu1 %v2761_v31, %s2980_s5  ;;  %1846 = vst [vmem:[%s3993_s20 + $0x88] sm:$0xff] (%p3048_p5), %v1845_v9   ;;  %v1885_v31 = vld [vmem:[%s3168_s10 + $0x98] sm:$0xff] (%p3048_p5)   ;;  %1882 = vst [vmem:[%s3993_s20 + $0x110] sm:$0xff] (%p3048_p5), %v1881_v22  }
 0x2f2   : > { %1886 = vst [vmem:[%s3993_s20 + $0x118] sm:$0xff] (%p3048_p5), %v1885_v31  }
 0x2f3   : > { %v1502_v38 = vpop.permute.xlu1 %1501 }
 0x2f4   : > { %2657 = vst.msk [vmem:[%s3168_s10 + $0xc4] sm:$0xf] %vm528_vm2, %v1502_v38  ;;  %1411 = vxpose.xlu0.b32.cont [11/16] (narrow) %v3601_v47, 8  ;;  %v1889_v38 = vld [vmem:[%s3168_s10 + $0xa0] sm:$0xff] (%p3048_p5)  }
 0x2f5   : > { %1529 = vrot.lane.b32.xlu1 %v2762_v50, %s2980_s5  ;;  %1890 = vst [vmem:[%s3993_s20 + $0x120] sm:$0xff] (%p3048_p5), %v1889_v38   ;;  %v1893_v50 = vld [vmem:[%s3168_s10 + $0xa8] sm:$0xff] (%p3048_p5)  }
 0x2f6   : > { %1894 = vst [vmem:[%s3993_s20 + $0x128] sm:$0xff] (%p3048_p5), %v1893_v50  }
 0x2f7   : > { %v1504_v40 = vpop.permute.xlu1 %1503 }
 0x2f8   : > { %2658 = vst.msk [vmem:[%s3168_s10 + $0xc8] sm:$0xf] %vm528_vm2, %v1504_v40  ;;  %1412 = vxpose.xlu0.b32.cont [12/16] (narrow) %v1376_v45, 8  ;;  %v1853_v45 = vld [vmem:[%s3168_s10 + $0x58] sm:$0xff] (%p3048_p5)   ;;  %v1897_v40 = vld [vmem:[%s3168_s10 + $0xb0] sm:$0xff] (%p3048_p5)  }
 0x2f9   : > { %1596 = vrot.lane.b32.xlu1 %v3743_v16, %s2979_s30  ;;  %v738_v16 = vpop.trf.xlu0  ;;  %1854 = vst [vmem:[%s3993_s20 + $0x98] sm:$0xff] (%p3048_p5), %v1853_v45   ;;  %1898 = vst [vmem:[%s3993_s20 + $0x130] sm:$0xff] (%p3048_p5), %v1897_v40  }
 0x2fa   : > { %754 = vst [vmem:[%s3933_s9] sm:$0x1] %v738_v16 }
 0x2fb   : > { %v1506_v61 = vpop.permute.xlu1 %1505 }
 0x2fc   : > { %2659 = vst.msk [vmem:[%s3168_s10 + $0xcc] sm:$0xf] %vm528_vm2, %v1506_v61  ;;  %1413 = vxpose.xlu0.b32.cont [13/16] (narrow) %v3607_v56, 8  ;;  %v1901_v61 = vld [vmem:[%s3168_s10 + $0xb8] sm:$0xff] (%p3048_p5)  }
 0x2fd   : > { %1598 = vrot.lane.b32.xlu1 %v3749_v29, %s2979_s30  ;;  %1902 = vst [vmem:[%s3993_s20 + $0x138] sm:$0xff] (%p3048_p5), %v1901_v61  }
 0x2ff   : > { %v1508_v47 = vpop.permute.xlu1 %1507 }
 0x300   : > { %2660 = vst.msk [vmem:[%s3168_s10 + $0xd0] sm:$0xf] %vm528_vm2, %v1508_v47  ;;  %1414 = vxpose.xlu0.b32.cont [14/16] (narrow) %v1380_v14, 8  ;;  %v1861_v14 = vld [vmem:[%s3168_s10 + $0x68] sm:$0xff] (%p3048_p5)   ;;  %v1905_v47 = vld [vmem:[%s3168_s10 + $0xc0] sm:$0xff] (%p3048_p5)  }
 0x301   : > { %1602 = vrot.lane.b32.xlu1 %v3804_v28, %s2979_s30  ;;  %1862 = vst [vmem:[%s3993_s20 + $0xa8] sm:$0xff] (%p3048_p5), %v1861_v14   ;;  %1906 = vst [vmem:[%s3993_s20 + $0x180] sm:$0xff] (%p3048_p5), %v1905_v47  }
 0x303   : > { %v1510_v2 = vpop.permute.xlu1 %1509 }
 0x304   : > { %2661 = vst.msk [vmem:[%s3168_s10 + $0xd4] sm:$0xf] %vm528_vm2, %v1510_v2  ;;  %1415 = vxpose.xlu0.b32.cont [15/16] (narrow) %v3613_v59, 8  ;;  %v1077_v59 = vpop.trf.xlu0  ;;  %v1909_v2 = vld [vmem:[%s3168_s10 + $0xc8] sm:$0xff] (%p3048_p5)  }
 0x305   : > { %1606 = vrot.lane.b32.xlu1 %v3816_v44, %s2979_s30  ;;  %2590 = vst [vmem:[%s3933_s9 + $0x1] sm:$0x1] %v1077_v59  ;;  %1910 = vst [vmem:[%s3993_s20 + $0x188] sm:$0xff] (%p3048_p5), %v1909_v2  }
 0x307   : > { %v1512_v56 = vpop.permute.xlu1 %1511 }
 0x308   : > { %2662 = vst.msk [vmem:[%s3168_s10 + $0xd8] sm:$0xf] %vm528_vm2, %v1512_v56  ;;  %1416 = vxpose.xlu0.b32.end [16/16] (narrow) %v1384_v49, 8  ;;  %v1873_v49 = vld [vmem:[%s3168_s10 + $0x80] sm:$0xff] (%p3048_p5)  }
 0x309   : > { %1610 = vrot.lane.b32.xlu1 %v3866_v11, %s2979_s30  ;;  %1874 = vst [vmem:[%s3993_s20 + $0x100] sm:$0xff] (%p3048_p5), %v1873_v49  }
 0x30b   : > { %v1514_v29 = vpop.permute.xlu1 %1513  ;;  %v1913_v56 = vld [vmem:[%s3168_s10 + $0xd0] sm:$0xff] (%p3048_p5)  }
 0x30c   : > { %2663 = vst.msk [vmem:[%s3168_s10 + $0xdc] sm:$0xf] %vm528_vm2, %v1514_v29  ;;  %1914 = vst [vmem:[%s3993_s20 + $0x190] sm:$0xff] (%p3048_p5), %v1913_v56  }
 0x30d   : > { %1614 = vrot.lane.b32.xlu1 %v3710_v18, %s2979_s30 }
 0x30f   : > { %v1516_v5 = vpop.permute.xlu1 %1515 }
 0x310   : > { %2664 = vst.msk [vmem:[%s3168_s10 + $0xe0] sm:$0xf] %vm528_vm2, %v1516_v5 }
 0x311   : > { %1618 = vrot.lane.b32.xlu1 %v3776_v60, %s2979_s30 }
 0x313   : > { %v1694_v19 = vpop.permute.xlu1 %1693  ;;  %v1917_v16 = vld [vmem:[%s3168_s10 + $0xd8] sm:$0xff] (%p3048_p5)  }
 0x314   : > { %1741 = vxpose.xlu0.b32.start [1/16] (narrow) %v1694_v19, 8  ;;  %1918 = vst [vmem:[%s3993_s20 + $0x198] sm:$0xff] (%p3048_p5), %v1917_v16  }
 0x315   : > { %1622 = vrot.lane.b32.xlu1 %v1448_v35, %s2979_s30  ;;  %v1869_v35 = vld [vmem:[%s3168_s10 + $0x78] sm:$0xff] (%p3048_p5)  }
 0x316   : > { %1870 = vst [vmem:[%s3993_s20 + $0xb8] sm:$0xff] (%p3048_p5), %v1869_v35  }
 0x317   : > { %v1696_v27 = vpop.permute.xlu1 %1695 }
 0x318   : > { %1742 = vxpose.xlu0.b32.cont [2/16] (narrow) %v1696_v27, 8 }
 0x319   : > { %1626 = vrot.lane.b32.xlu1 %v3885_v53, %s2979_s30  ;;  %v1833_v53 = vld [vmem:[%s3168_s10 + $0x30] sm:$0xff] (%p3048_p5)  }
 0x31a   : > { %1834 = vst [vmem:[%s3993_s20 + $0x30] sm:$0xff] (%p3048_p5), %v1833_v53  }
 0x31b   : > { %v1698_v28 = vpop.permute.xlu1 %1697 }
 0x31c   : > { %1743 = vxpose.xlu0.b32.cont [3/16] (narrow) %v1698_v28, 8 }
 0x31f   : > { %v1700_v34 = vpop.permute.xlu1 %1699 }
 0x320   : > { %1744 = vxpose.xlu0.b32.cont [4/16] (narrow) %v1700_v34, 8 }
 0x323   : > { %v1702_v18 = vpop.permute.xlu1 %1701 }
 0x324   : > { %1745 = vxpose.xlu0.b32.cont [5/16] (narrow) %v1702_v18, 8 }
 0x327   : > { %v1704_v37 = vpop.permute.xlu1 %1703 }
 0x328   : > { %1746 = vxpose.xlu0.b32.cont [6/16] (narrow) %v1704_v37, 8 }
 0x32b   : > { %v1706_v23 = vpop.permute.xlu1 %1705 }
 0x32c   : > { %1747 = vxpose.xlu0.b32.cont [7/16] (narrow) %v1706_v23, 8 }
 0x32f   : > { %v1708_v60 = vpop.permute.xlu1 %1707 }
 0x330   : > { %1748 = vxpose.xlu0.b32.cont [8/16] (narrow) %v1708_v60, 8 }
 0x333   : > { %v1710_v39 = vpop.permute.xlu1 %1709 }
 0x334   : > { %1749 = vxpose.xlu0.b32.cont [9/16] (narrow) %v1710_v39, 8 }
 0x337   : > { %v1712_v24 = vpop.permute.xlu1 %1711 }
 0x338   : > { %1750 = vxpose.xlu0.b32.cont [10/16] (narrow) %v1712_v24, 8 }
 0x33b   : > { %v1714_v44 = vpop.permute.xlu1 %1713 }
 0x33c   : > { %1751 = vxpose.xlu0.b32.cont [11/16] (narrow) %v1714_v44, 8 }
 0x33f   : > { %v1716_v51 = vpop.permute.xlu1 %1715 }
 0x340   : > { %1752 = vxpose.xlu0.b32.cont [12/16] (narrow) %v1716_v51, 8 }
 0x343   : > { %v1718_v46 = vpop.permute.xlu1 %1717 }
 0x344   : > { %1753 = vxpose.xlu0.b32.cont [13/16] (narrow) %v1718_v46, 8 }
 0x347   : > { %v1722_v33 = vpop.permute.xlu1 %1721 }
 0x348   : > { %1754 = vxpose.xlu0.b32.cont [14/16] (narrow) %v3619_v13, 8 }
 0x34b   : > { %v1724_v20 = vpop.permute.xlu1 %1723 }
 0x34c   : > { %1755 = vxpose.xlu0.b32.cont [15/16] (narrow) %v1722_v33, 8  ;;  %v1417_v57 = vpop.trf.xlu0 }
 0x34d   : > { %2639 = vst [vmem:[%s3933_s9 + $0x2] sm:$0x1] %v1417_v57 }
 0x34f   : > { %v1518_v54 = vpop.permute.xlu1 %1517 }
 0x350   : > { %2665 = vst.msk [vmem:[%s3168_s10 + $0xe4] sm:$0xf] %vm528_vm2, %v1518_v54  ;;  %1756 = vxpose.xlu0.b32.end [16/16] (narrow) %v1724_v20, 8 }
 0x353   : > { %v1520_v41 = vpop.permute.xlu1 %1519 }
 0x354   : > { %2666 = vst.msk [vmem:[%s3168_s10 + $0xe8] sm:$0xf] %vm528_vm2, %v1520_v41 }
 0x357   : > { %v1522_v10 = vpop.permute.xlu1 %1521  ;;  %v1921_v29 = vld [vmem:[%s3168_s10 + $0xe0] sm:$0xff] (%p3048_p5)  }
 0x358   : > { %2667 = vst.msk [vmem:[%s3168_s10 + $0xec] sm:$0xf] %vm528_vm2, %v1522_v10  ;;  %1922 = vst [vmem:[%s3993_s20 + $0x1a0] sm:$0xff] (%p3048_p5), %v1921_v29  }
 0x35b   : > { %v1524_v13 = vpop.permute.xlu1 %1523 }
 0x35c   : > { %2668 = vst.msk [vmem:[%s3168_s10 + $0xf0] sm:$0xf] %vm528_vm2, %v1524_v13 }
 0x35f   : > { %v1526_v25 = vpop.permute.xlu1 %1525  ;;  %v1925_v59 = vld [vmem:[%s3168_s10 + $0xe8] sm:$0xff] (%p3048_p5)  }
 0x360   : > { %2669 = vst.msk [vmem:[%s3168_s10 + $0xf4] sm:$0xf] %vm528_vm2, %v1526_v25  ;;  %1926 = vst [vmem:[%s3993_s20 + $0x1a8] sm:$0xff] (%p3048_p5), %v1925_v59  }
 0x363   : > { %v1528_v6 = vpop.permute.xlu1 %1527 }
 0x364   : > { %2670 = vst.msk [vmem:[%s3168_s10 + $0xf8] sm:$0xf] %vm528_vm2, %v1528_v6 }
 0x367   : > { %v1530_v17 = vpop.permute.xlu1 %1529  ;;  %v1929_v5 = vld [vmem:[%s3168_s10 + $0xf0] sm:$0xff] (%p3048_p5)  }
 0x368   : > { %2671 = vst.msk [vmem:[%s3168_s10 + $0xfc] sm:$0xf] %vm528_vm2, %v1530_v17  ;;  %1930 = vst [vmem:[%s3993_s20 + $0x1b0] sm:$0xff] (%p3048_p5), %v1929_v5  }
 0x36b   : > { %v1597_v58 = vpop.permute.xlu1 %1596 }
 0x36c   : > { %2672 = vst.msk [vmem:[%s3407_s28 + $0x180] sm:$0xff] %vm625_vm3, %v1597_v58 }
 0x36f   : > { %v1599_v12 = vpop.permute.xlu1 %1598  ;;  %v1933_v19 = vld [vmem:[%s3168_s10 + $0xf8] sm:$0xff] (%p3048_p5)  }
 0x370   : > { %2673 = vst.msk [vmem:[%s3407_s28 + $0x188] sm:$0xff] %vm625_vm3, %v1599_v12  ;;  %1934 = vst [vmem:[%s3993_s20 + $0x1b8] sm:$0xff] (%p3048_p5), %v1933_v19  }
 0x373   : > { %v1603_v52 = vpop.permute.xlu1 %1602 }
 0x374   : > { %2675 = vst.msk [vmem:[%s3407_s28 + $0x198] sm:$0xff] %vm625_vm3, %v1603_v52 }
 0x377   : > { %v1607_v3 = vpop.permute.xlu1 %1606 }
 0x378   : > { %2677 = vst.msk [vmem:[%s3407_s28 + $0x1a8] sm:$0xff] %vm625_vm3, %v1607_v3 }
 0x37b   : > { %v1611_v0 = vpop.permute.xlu1 %1610 }
 0x37c   : > { %2679 = vst.msk [vmem:[%s3407_s28 + $0x1b8] sm:$0xff] %vm625_vm3, %v1611_v0 }
 0x37f   : > { %v1615_v11 = vpop.permute.xlu1 %1614 }
 0x380   : > { %2681 = vst.msk [vmem:[%s3407_s28 + $0x1c8] sm:$0xff] %vm625_vm3, %v1615_v11 }
 0x383   : > { %v1619_v8 = vpop.permute.xlu1 %1618 }
 0x384   : > { %2683 = vst.msk [vmem:[%s3407_s28 + $0x1d8] sm:$0xff] %vm625_vm3, %v1619_v8 }
 0x387   : > { %v1623_v43 = vpop.permute.xlu1 %1622 }
 0x388   : > { %2685 = vst.msk [vmem:[%s3407_s28 + $0x1e8] sm:$0xff] %vm625_vm3, %v1623_v43 }
 0x38b   : > { %v1627_v36 = vpop.permute.xlu1 %1626 }
 0x38c   : > { %2687 = vst.msk [vmem:[%s3407_s28 + $0x1f8] sm:$0xff] %vm625_vm3, %v1627_v36 }
 0x38f   : > { %1790 = sbr.rel (!%p3048_p5) target bundleno = 918 (0x396), region = 32 }
 0x394   : > { %v1757_v55 = vpop.trf.xlu0 }
 0x395   : > { %2688 = vst [vmem:[%s3933_s9 + $0x3] sm:$0x1] %v1757_v55 }
 0x396 PF: > { %2087 = sbr.rel (!%p3048_p5) target bundleno = 952 (0x3b8), region = 73  ;;  %s2764_s22 = sshll.u32 (%p3048_p5), %s3031_s19, 7  ;;  %v2244_v27 = vld [vmem:[%s3407_s28] sm:$0xff] (%p3048_p5)  ;;  %v2246_v28 = vld [vmem:[%s3407_s28 + $0x8] sm:$0xff] (%p3048_p5)  ;;  %v2248_v34 = vld [vmem:[%s3407_s28 + $0x10] sm:$0xff] (%p3048_p5) }
 0x397   : > { %s4065_s27 = scalar_lea.vmem (%p3048_p5), %s4244_s3, %s2764_s22  ;;  %v2250_v18 = vld [vmem:[%s3407_s28 + $0x18] sm:$0xff] (%p3048_p5)  ;;  %v2252_v37 = vld [vmem:[%s3407_s28 + $0x20] sm:$0xff] (%p3048_p5)  ;;  %v2254_v23 = vld [vmem:[%s3407_s28 + $0x28] sm:$0xff] (%p3048_p5) }
 0x398   : > { %2245 = vst [vmem:[%s4065_s27] sm:$0xff] (%p3048_p5), %v2244_v27  ;;  %2247 = vst [vmem:[%s4065_s27 + $0x8] sm:$0xff] (%p3048_p5), %v2246_v28  ;;  %v2256_v60 = vld [vmem:[%s3407_s28 + $0x30] sm:$0xff] (%p3048_p5)  ;;  %v2258_v39 = vld [vmem:[%s3407_s28 + $0x38] sm:$0xff] (%p3048_p5) }
 0x399   : > { %2249 = vst [vmem:[%s4065_s27 + $0x10] sm:$0xff] (%p3048_p5), %v2248_v34  ;;  %2251 = vst [vmem:[%s4065_s27 + $0x18] sm:$0xff] (%p3048_p5), %v2250_v18  ;;  %v2260_v24 = vld [vmem:[%s3407_s28 + $0x40] sm:$0xff] (%p3048_p5)  ;;  %v2262_v44 = vld [vmem:[%s3407_s28 + $0x48] sm:$0xff] (%p3048_p5) }
 0x39a   : > { %2253 = vst [vmem:[%s4065_s27 + $0x20] sm:$0xff] (%p3048_p5), %v2252_v37  ;;  %2255 = vst [vmem:[%s4065_s27 + $0x28] sm:$0xff] (%p3048_p5), %v2254_v23  ;;  %v2264_v51 = vld [vmem:[%s3407_s28 + $0x50] sm:$0xff] (%p3048_p5)  ;;  %v2266_v46 = vld [vmem:[%s3407_s28 + $0x58] sm:$0xff] (%p3048_p5) }
 0x39b   : > { %2257 = vst [vmem:[%s4065_s27 + $0x30] sm:$0xff] (%p3048_p5), %v2256_v60  ;;  %2259 = vst [vmem:[%s4065_s27 + $0x38] sm:$0xff] (%p3048_p5), %v2258_v39  ;;  %v2268_v33 = vld [vmem:[%s3407_s28 + $0x60] sm:$0xff] (%p3048_p5)  ;;  %v2270_v20 = vld [vmem:[%s3407_s28 + $0x68] sm:$0xff] (%p3048_p5) }
 0x39c   : > { %2261 = vst [vmem:[%s4065_s27 + $0x40] sm:$0xff] (%p3048_p5), %v2260_v24  ;;  %2263 = vst [vmem:[%s4065_s27 + $0x48] sm:$0xff] (%p3048_p5), %v2262_v44  ;;  %v2272_v57 = vld [vmem:[%s3407_s28 + $0x70] sm:$0xff] (%p3048_p5)  ;;  %v2274_v54 = vld [vmem:[%s3407_s28 + $0x78] sm:$0xff] (%p3048_p5) }
 0x39d   : > { %2265 = vst [vmem:[%s4065_s27 + $0x50] sm:$0xff] %v2264_v51  ;;  %2267 = vst [vmem:[%s4065_s27 + $0x58] sm:$0xff] %v2266_v46  ;;  %v2276_v41 = vld [vmem:[%s3407_s28 + $0x80] sm:$0xff]  ;;  %v2278_v10 = vld [vmem:[%s3407_s28 + $0x88] sm:$0xff] }
 0x39e   : > { %2269 = vst [vmem:[%s4065_s27 + $0x60] sm:$0xff] %v2268_v33  ;;  %2271 = vst [vmem:[%s4065_s27 + $0x68] sm:$0xff] %v2270_v20  ;;  %v2280_v13 = vld [vmem:[%s3407_s28 + $0x90] sm:$0xff]  ;;  %v2282_v25 = vld [vmem:[%s3407_s28 + $0x98] sm:$0xff] }
 0x39f   : > { %2273 = vst [vmem:[%s4065_s27 + $0x70] sm:$0xff] %v2272_v57  ;;  %2275 = vst [vmem:[%s4065_s27 + $0x78] sm:$0xff] %v2274_v54  ;;  %v2284_v6 = vld [vmem:[%s3407_s28 + $0xa0] sm:$0xff]  ;;  %v2286_v17 = vld [vmem:[%s3407_s28 + $0xa8] sm:$0xff] }
 0x3a0   : > { %2277 = vst [vmem:[%s4065_s27 + $0x100] sm:$0xff] %v2276_v41  ;;  %2279 = vst [vmem:[%s4065_s27 + $0x108] sm:$0xff] %v2278_v10  ;;  %v2288_v58 = vld [vmem:[%s3407_s28 + $0xb0] sm:$0xff]  ;;  %v2290_v12 = vld [vmem:[%s3407_s28 + $0xb8] sm:$0xff] }
 0x3a1   : > { %2281 = vst [vmem:[%s4065_s27 + $0x110] sm:$0xff] %v2280_v13  ;;  %2283 = vst [vmem:[%s4065_s27 + $0x118] sm:$0xff] %v2282_v25  ;;  %v2292_v52 = vld [vmem:[%s3407_s28 + $0xc0] sm:$0xff]  ;;  %v2294_v3 = vld [vmem:[%s3407_s28 + $0xc8] sm:$0xff] }
 0x3a2   : > { %2285 = vst [vmem:[%s4065_s27 + $0x120] sm:$0xff] %v2284_v6  ;;  %2287 = vst [vmem:[%s4065_s27 + $0x128] sm:$0xff] %v2286_v17  ;;  %v2296_v0 = vld [vmem:[%s3407_s28 + $0xd0] sm:$0xff]  ;;  %v2298_v11 = vld [vmem:[%s3407_s28 + $0xd8] sm:$0xff] }
 0x3a3   : > { %2289 = vst [vmem:[%s4065_s27 + $0x130] sm:$0xff] %v2288_v58  ;;  %2291 = vst [vmem:[%s4065_s27 + $0x138] sm:$0xff] %v2290_v12  ;;  %v2300_v8 = vld [vmem:[%s3407_s28 + $0xe0] sm:$0xff]  ;;  %v2302_v43 = vld [vmem:[%s3407_s28 + $0xe8] sm:$0xff] }
 0x3a4   : > { %2293 = vst [vmem:[%s4065_s27 + $0x140] sm:$0xff] %v2292_v52  ;;  %2295 = vst [vmem:[%s4065_s27 + $0x148] sm:$0xff] %v2294_v3  ;;  %v2304_v36 = vld [vmem:[%s3407_s28 + $0xf0] sm:$0xff]  ;;  %v2306_v55 = vld [vmem:[%s3407_s28 + $0xf8] sm:$0xff] }
 0x3a5   : > { %2297 = vst [vmem:[%s4065_s27 + $0x150] sm:$0xff] %v2296_v0  ;;  %2299 = vst [vmem:[%s4065_s27 + $0x158] sm:$0xff] %v2298_v11  ;;  %v2308_v15 = vld [vmem:[%s3407_s28 + $0x100] sm:$0xff]  ;;  %v2310_v63 = vld [vmem:[%s3407_s28 + $0x108] sm:$0xff] }
 0x3a6   : > { %2301 = vst [vmem:[%s4065_s27 + $0x160] sm:$0xff] %v2300_v8  ;;  %2303 = vst [vmem:[%s4065_s27 + $0x168] sm:$0xff] %v2302_v43  ;;  %v2312_v26 = vld [vmem:[%s3407_s28 + $0x110] sm:$0xff]  ;;  %v2314_v7 = vld [vmem:[%s3407_s28 + $0x118] sm:$0xff] }
 0x3a7   : > { %2305 = vst [vmem:[%s4065_s27 + $0x170] sm:$0xff] %v2304_v36  ;;  %2307 = vst [vmem:[%s4065_s27 + $0x178] sm:$0xff] %v2306_v55  ;;  %v2316_v42 = vld [vmem:[%s3407_s28 + $0x120] sm:$0xff]  ;;  %v2318_v21 = vld [vmem:[%s3407_s28 + $0x128] sm:$0xff] }
 0x3a8   : > { %2309 = vst [vmem:[%s4065_s27 + $0x200] sm:$0xff] %v2308_v15  ;;  %2311 = vst [vmem:[%s4065_s27 + $0x208] sm:$0xff] %v2310_v63  ;;  %v2320_v53 = vld [vmem:[%s3407_s28 + $0x130] sm:$0xff]  ;;  %v2322_v48 = vld [vmem:[%s3407_s28 + $0x138] sm:$0xff] }
 0x3a9   : > { %2313 = vst [vmem:[%s4065_s27 + $0x210] sm:$0xff] %v2312_v26  ;;  %2315 = vst [vmem:[%s4065_s27 + $0x218] sm:$0xff] %v2314_v7  ;;  %v2324_v1 = vld [vmem:[%s3407_s28 + $0x140] sm:$0xff]  ;;  %v2326_v9 = vld [vmem:[%s3407_s28 + $0x148] sm:$0xff] }
 0x3aa   : > { %2317 = vst [vmem:[%s4065_s27 + $0x220] sm:$0xff] %v2316_v42  ;;  %2319 = vst [vmem:[%s4065_s27 + $0x228] sm:$0xff] %v2318_v21  ;;  %v2328_v32 = vld [vmem:[%s3407_s28 + $0x150] sm:$0xff]  ;;  %v2330_v45 = vld [vmem:[%s3407_s28 + $0x158] sm:$0xff] }
 0x3ab   : > { %2321 = vst [vmem:[%s4065_s27 + $0x230] sm:$0xff] %v2320_v53  ;;  %2323 = vst [vmem:[%s4065_s27 + $0x238] sm:$0xff] %v2322_v48  ;;  %v2332_v62 = vld [vmem:[%s3407_s28 + $0x160] sm:$0xff]  ;;  %v2334_v14 = vld [vmem:[%s3407_s28 + $0x168] sm:$0xff] }
 0x3ac   : > { %2325 = vst [vmem:[%s4065_s27 + $0x240] sm:$0xff] %v2324_v1  ;;  %2327 = vst [vmem:[%s4065_s27 + $0x248] sm:$0xff] %v2326_v9  ;;  %v2336_v30 = vld [vmem:[%s3407_s28 + $0x170] sm:$0xff]  ;;  %v2338_v35 = vld [vmem:[%s3407_s28 + $0x178] sm:$0xff] }
 0x3ad   : > { %2329 = vst [vmem:[%s4065_s27 + $0x250] sm:$0xff] %v2328_v32  ;;  %2331 = vst [vmem:[%s4065_s27 + $0x258] sm:$0xff] %v2330_v45  ;;  %v2340_v49 = vld [vmem:[%s3407_s28 + $0x180] sm:$0xff]  ;;  %v2342_v4 = vld [vmem:[%s3407_s28 + $0x188] sm:$0xff] }
 0x3ae   : > { %2333 = vst [vmem:[%s4065_s27 + $0x260] sm:$0xff] %v2332_v62  ;;  %2335 = vst [vmem:[%s4065_s27 + $0x268] sm:$0xff] %v2334_v14  ;;  %v2344_v22 = vld [vmem:[%s3407_s28 + $0x190] sm:$0xff]  ;;  %v2346_v31 = vld [vmem:[%s3407_s28 + $0x198] sm:$0xff] }
 0x3af   : > { %2337 = vst [vmem:[%s4065_s27 + $0x270] sm:$0xff] %v2336_v30  ;;  %2339 = vst [vmem:[%s4065_s27 + $0x278] sm:$0xff] %v2338_v35  ;;  %v2348_v38 = vld [vmem:[%s3407_s28 + $0x1a0] sm:$0xff]  ;;  %v2350_v50 = vld [vmem:[%s3407_s28 + $0x1a8] sm:$0xff] }
 0x3b0   : > { %2341 = vst [vmem:[%s4065_s27 + $0x300] sm:$0xff] %v2340_v49  ;;  %2343 = vst [vmem:[%s4065_s27 + $0x308] sm:$0xff] %v2342_v4  ;;  %v2352_v40 = vld [vmem:[%s3407_s28 + $0x1b0] sm:$0xff]  ;;  %v2354_v61 = vld [vmem:[%s3407_s28 + $0x1b8] sm:$0xff] }
 0x3b1   : > { %2345 = vst [vmem:[%s4065_s27 + $0x310] sm:$0xff] %v2344_v22  ;;  %2347 = vst [vmem:[%s4065_s27 + $0x318] sm:$0xff] %v2346_v31  ;;  %v2356_v47 = vld [vmem:[%s3407_s28 + $0x1c0] sm:$0xff]  ;;  %v2358_v2 = vld [vmem:[%s3407_s28 + $0x1c8] sm:$0xff] }
 0x3b2   : > { %2349 = vst [vmem:[%s4065_s27 + $0x320] sm:$0xff] %v2348_v38  ;;  %2351 = vst [vmem:[%s4065_s27 + $0x328] sm:$0xff] %v2350_v50  ;;  %v2360_v56 = vld [vmem:[%s3407_s28 + $0x1d0] sm:$0xff]  ;;  %v2362_v16 = vld [vmem:[%s3407_s28 + $0x1d8] sm:$0xff] }
 0x3b3   : > { %2353 = vst [vmem:[%s4065_s27 + $0x330] sm:$0xff] %v2352_v40  ;;  %2355 = vst [vmem:[%s4065_s27 + $0x338] sm:$0xff] %v2354_v61  ;;  %v2364_v29 = vld [vmem:[%s3407_s28 + $0x1e0] sm:$0xff]  ;;  %v2366_v59 = vld [vmem:[%s3407_s28 + $0x1e8] sm:$0xff] }
 0x3b4   : > { %2357 = vst [vmem:[%s4065_s27 + $0x340] sm:$0xff] %v2356_v47  ;;  %2359 = vst [vmem:[%s4065_s27 + $0x348] sm:$0xff] %v2358_v2  ;;  %v2368_v5 = vld [vmem:[%s3407_s28 + $0x1f0] sm:$0xff]  ;;  %v2370_v19 = vld [vmem:[%s3407_s28 + $0x1f8] sm:$0xff] }
 0x3b5   : > { %2361 = vst [vmem:[%s4065_s27 + $0x350] sm:$0xff] %v2360_v56  ;;  %2363 = vst [vmem:[%s4065_s27 + $0x358] sm:$0xff] %v2362_v16 }
 0x3b6   : > { %2365 = vst [vmem:[%s4065_s27 + $0x360] sm:$0xff] %v2364_v29  ;;  %2367 = vst [vmem:[%s4065_s27 + $0x368] sm:$0xff] %v2366_v59 }
 0x3b7   : > { %2369 = vst [vmem:[%s4065_s27 + $0x370] sm:$0xff] %v2368_v5  ;;  %2371 = vst [vmem:[%s4065_s27 + $0x378] sm:$0xff] %v2370_v19 }
 0x3b8 PF: > { %s4196_s30 = scalar_lea.hbm %s4245_s4, %s3068_s7  ;;  %s2383_s5 = sshll.u32 %s3933_s9, 4  ;;  %s4199_s5 = int_to_ptr.vmem [resolvable:$true] %s2383_s5 }
 0x3b9   : > { %s2906_s8 = scalar_lea.vmem %s4199_s5, 64  ;;  %s2981_s28 = smov [#allocation5]  }
 0x3ba   : > { %p2907_p11 = scmp.ne.s32.totalorder %s4199_s5, %s2906_s8  ;;  %s2910_s12 = sshll.u32 %s2981_s28, 4  ;;  %s2911_s12 = int_to_ptr.vmem [resolvable:$false] %s2910_s12 }
 0x3bb   : > { %s2912_s13 = scalar_lea.vmem %s2911_s12, 128  ;;  %p2913_p0 = scmp.lt.s32.totalorder %s4199_s5, %s2911_s12 }
 0x3bc   : > { %p2908_p12 = pnand %p2907_p11, %p3048_p5  ;;  %p2914_p1 = scmp.lt.s32.totalorder %s2912_s13, %s2906_s8 }
 0x3be   : > { %p2909_p13 = pneg %p2908_p12  ;;  %p2915_p2 = por %p2914_p1, %p2913_p0 }
 0x3c0   : > { %p2916_p3 = pnand %p2915_p2, %p2909_p13 }
 0x3c2   : > { %2919 = shalt.err (!%p2916_p3)
}
 0x3c3   : > { %s2920_s7 = scalar_lea.hbm %s4196_s30, 64  ;;  %s2924_s20 = scalar_lea.hbm %s4245_s4, 128 }
 0x3c4   : > { %p2921_p4 = scmp.ne.s32.totalorder %s4196_s30, %s2920_s7  ;;  %p2925_p9 = scmp.lt.u32.totalorder %s4196_s30, %s4245_s4 }
 0x3c5   : > { %p2926_p10 = scmp.lt.u32.totalorder %s2924_s20, %s2920_s7  ;;  %p2928_p12 = scmp.lt.u32.totalorder %s2920_s7, %s4196_s30 }
 0x3c6   : > { %p2922_p7 = pnand %p2921_p4, %p3048_p5 }
 0x3c7   : > { %p2927_p11 = por %p2926_p10, %p2925_p9 }
 0x3c8   : > { %p2923_p8 = pneg %p2922_p7 }
 0x3c9   : > { %p2929_p13 = por %p2928_p12, %p2927_p11 }
 0x3cb   : > { %p2930_p0 = pnand %p2929_p13, %p2923_p8 }
 0x3cd   : > { %2933 = shalt.err (!%p2930_p0)
}
 0x3ce   : > { %s2982_s23 = smov 16   ;;  %s2983_s27 = smov 32  }
 0x3cf   : > { %s2984_s19 = smov 1  }
 0x3d0   : > { %2853 = dma.vmem_to_hbm [thread:$0]  (%p3048_p5), %s4199_s5, 64, %s4196_s30, %s1784_s11, %s2982_s23, %s2983_s27, %s2984_s19  }
 0x3d1 PF: > { %p2859_p1 = scmp.ge.s32.totalorder %s2968_s18, 2  ;;  %s2412_s29 = sand.u32 1, %s2956_s15  }
 0x3d2   : > { %s2413_s8 = scalar_lea.sflag [#allocation6], %s2412_s29 }
 0x3d3   : > { %p2856_p2 = pnand %p2859_p1, %p3052_p6 }
 0x3d5   : > { %2951 = dma.done.wait (!%p2856_p2), %s2413_s8, 64  }
 0x3d6   : > { %2953 = vsyncadd (!%p2856_p2), %s2413_s8, 4294967232  ;;  %p15_p3 = scmp.ge.s32.totalorder %s3035_s21, 4   ;;  %s4248_s15 = smov %s2960_s16 }
 0x3d7   : > { %s4249_s16 = smov %s2964_s17  ;;  %s4250_s17 = smov %s3046_s24 }
 0x3d8   : > { %s4251_s18 = smov %s3035_s21  ;;  %17 = sbr.rel (!%p15_p3) target bundleno = 3 (0x3), region = 175 }
 0x3df   :  { %2418 = vsyncpa [#allocation6], 1 }
 0x3e0   :  { %2420 = vsyncpa [#allocation6 + $0x1], 1 }

</bundles_post_ra>
